<compile_context>
chip_gen: v5e
topology: v5e:2x2
jax: 0.10.0
libtpu: 0.0.40
codegen_flags: <defaults>
</compile_context>

<pallas_src>
import functools

import jax
import jax.numpy as jnp
from jax.experimental import pallas as pl
from jax.experimental.pallas import tpu as pltpu


# ---------------------------------------------------------------------------
# Activations (applied to the f32 accumulator inside the kernel)
# ---------------------------------------------------------------------------
def _apply_act(x, act):
    act = act.lower()
    if act == "relu":
        return jnp.maximum(x, 0.0)
    if act == "relu6":
        return jnp.clip(x, 0.0, 6.0)
    if act == "hsigmoid":
        return jnp.clip(x / 6.0 + 0.5, 0.0, 1.0)
    if act == "h-swish":
        return x * jnp.clip(x / 6.0 + 0.5, 0.0, 1.0)
    if act == "silu":
        return x * jax.nn.sigmoid(x)
    if act == "gelu":
        return jax.nn.gelu(x, approximate=False)
    raise ValueError(f"activation '{act}' not supported")


# ---------------------------------------------------------------------------
# Pallas kernel: direct conv (sum of shifted matmuls) + activation, fused
# ---------------------------------------------------------------------------
def _conv_act_kernel(x_ref, w_ref, o_ref, *, kh, kw, stride, th, wo, act):
    # x_ref: (1, Hp, Wp, C)        zero-padded NHWC image for this batch (bf16)
    # w_ref: (kh*kw, C, Opad)      weight taps, lane-dense in Opad (bf16)
    # o_ref: (1, th, Wo, Opad)     output row-tile (f32), lane-dense in Opad
    ht = pl.program_id(1)
    opad = o_ref.shape[-1]
    c = x_ref.shape[-1]

    band_h = (th - 1) * stride + kh          # input rows needed by this tile
    row0 = ht * (th * stride)                # first padded-input row
    band = x_ref[0, pl.ds(row0, band_h), :, :]   # (band_h, Wp, C) value

    acc = jnp.zeros((th * wo, opad), jnp.float32)
    for i in range(kh):
        for j in range(kw):
            # shifted window for tap (i, j): (th, wo, C)
            xs = band[i : i + (th - 1) * stride + 1 : stride,
                      j : j + (wo - 1) * stride + 1 : stride, :]
            acc = acc + jnp.dot(
                xs.reshape(th * wo, c),
                w_ref[i * kw + j],                       # (C, Opad)
                preferred_element_type=jnp.float32,
            )

    acc = _apply_act(acc, act)                            # fused activation
    o_ref[0] = acc.reshape(th, wo, opad).astype(o_ref.dtype)


# ---------------------------------------------------------------------------
# Helpers
# ---------------------------------------------------------------------------
def _round_up(x, m):
    return ((x + m - 1) // m) * m


def _largest_divisor_leq(n, cap):
    cap = max(1, min(n, cap))
    for d in range(cap, 0, -1):
        if n % d == 0:
            return d
    return 1


def prepare_conv_act_weight(weight_ocik, o_pad):
    """(O, C, kh, kw) torch layout -> (kh*kw, C, Opad) bf16 taps.

    Hoist this out of the per-step call when the weight is static.
    """
    O, C, kh, kw = weight_ocik.shape
    w = jnp.transpose(weight_ocik, (2, 3, 1, 0)).reshape(kh * kw, C, O)
    w = jnp.pad(w, ((0, 0), (0, 0), (0, o_pad - O)))
    return w.astype(jnp.bfloat16)


# ---------------------------------------------------------------------------
# ConvAct wrapper (Conv2d, groups=1, bias=False) + activation
# ---------------------------------------------------------------------------
def conv_act(x_nchw, weight_ocik, *, stride=1, padding=0, act="relu"):
    """Conv2d(in,out,k,stride,padding,bias=False,groups=1) + activation.

    x_nchw:      (N, C, H, W)   -- torch input layout
    weight_ocik: (O, C, kh, kw) -- torch Conv2d weight layout
    returns:     (N, O, Ho, Wo) -- torch output layout
    """
    N, C, H, W = x_nchw.shape
    O, Cw, kh, kw = weight_ocik.shape
    assert C == Cw, "groups=1 only"  # TODO(synk): grouped conv not implemented

    Ho = (H + 2 * padding - kh) // stride + 1
    Wo = (W + 2 * padding - kw) // stride + 1
    Hp, Wp = H + 2 * padding, W + 2 * padding
    Opad = _round_up(max(O, 128), 128)      # lane-dense output channels

    # Weight -> (kh*kw, C, Opad) bf16 (cheap; hoistable per-weight).
    w = prepare_conv_act_weight(weight_ocik, Opad)

    # Input NCHW -> NHWC, zero-pad spatial dims, bf16 operands for the MXU.
    x = jnp.transpose(x_nchw, (0, 2, 3, 1))
    x = jnp.pad(x, ((0, 0), (padding, padding), (padding, padding), (0, 0)))
    x = x.astype(jnp.bfloat16)

    # Output-row tile: largest divisor of Ho keeping ~<=512 matmul rows/tile.
    th = _largest_divisor_leq(Ho, max(1, 512 // max(1, Wo)))
    grid = (N, Ho // th)

    kernel = functools.partial(
        _conv_act_kernel, kh=kh, kw=kw, stride=stride, th=th, wo=Wo, act=act
    )

    out = pl.pallas_call(
        kernel,
        out_shape=jax.ShapeDtypeStruct((N, Ho, Wo, Opad), jnp.float32),
        grid_spec=pltpu.PrefetchScalarGridSpec(
            num_scalar_prefetch=0,
            grid=grid,
            in_specs=[
                # Whole padded image per batch element; block index does not
                # change across the row-tile axis, so it is not re-fetched.
                pl.BlockSpec((1, Hp, Wp, C), lambda n, h: (n, 0, 0, 0)),
                # Full (small) weight, replicated across the grid.
                pl.BlockSpec((kh * kw, C, Opad), lambda n, h: (0, 0, 0)),
            ],
            out_specs=pl.BlockSpec((1, th, Wo, Opad), lambda n, h: (n, h, 0, 0)),
        ),
        compiler_params=pltpu.CompilerParams(
            dimension_semantics=("parallel", "parallel"),
            vmem_limit_bytes=32 * 1024 * 1024,
        ),
    )(x, w)

    out = out[..., :O]                        # drop out-channel padding
    # Back to torch NCHW layout.  (Skip this transpose if the consumer
    # accepts NHWC.)
    return jnp.transpose(out, (0, 3, 1, 2))


# ---------------------------------------------------------------------------
# Demo / self-check
# ---------------------------------------------------------------------------
if __name__ == "__main__":
    # ConvAct(in_channel=4, out_channel=8, kernel_size=3, stride=1, padding=1,
    #         bias=False, act='relu', groups=1)
    N, C, H, W = 2, 4, 16, 16
    O, K = 8, 3
    stride, padding = 1, 1

    key = jax.random.PRNGKey(0)
    kx, kw_ = jax.random.split(key)
    x = jax.random.normal(kx, (N, C, H, W), dtype=jnp.float32)
    weight = jax.random.normal(kw_, (O, C, K, K), dtype=jnp.float32) * 0.1

    f = jax.jit(conv_act, static_argnames=("stride", "padding", "act"))
    y = f(x, weight, stride=stride, padding=padding, act="relu")
    y = jax.block_until_ready(y)

    # Reference: XLA conv (same semantics as torch Conv2d) + ReLU, in f32.
    y_ref = jax.lax.conv_general_dilated(
        x, weight,
        window_strides=(stride, stride),
        padding=((padding, padding), (padding, padding)),
        dimension_numbers=("NCHW", "OIHW", "NCHW"),
    )
    y_ref = jnp.maximum(y_ref, 0.0)

    assert y.shape == (N, O, H, W)
    # bf16 operands with f32 accumulation -> slightly loosened tolerance.
    assert jnp.allclose(y, y_ref, atol=3e-2, rtol=3e-2)

    print("KERNEL_OK")
</pallas_src>

<mosaic_0001>
module attributes {stable_mosaic.version = 11 : i64} {
  func.func @_conv_act_kernel(%arg0: i32, %arg1: i32, %arg2: memref<1x18x18x4xbf16, #tpu.memory_space<vmem>>, %arg3: memref<9x4x128xbf16, #tpu.memory_space<vmem>>, %arg4: memref<1x16x16x128xf32, #tpu.memory_space<vmem>>) attributes {dimension_semantics = [#tpu.dimension_semantics<parallel>, #tpu.dimension_semantics<parallel>], iteration_bounds = array<i64: 2, 1>, scalar_prefetch = 0 : i64, scratch_operands = 0 : i64, tpu.core_type = #tpu.core_type<tc>, window_params = [{transform_indices = @transform_0, window_bounds = array<i64: 1, 18, 18, 4>}, {pipeline_mode = #tpu.pipeline_mode<synchronous>, transform_indices = @transform_1, window_bounds = array<i64: 9, 4, 128>}, {transform_indices = @transform_2, window_bounds = array<i64: 1, 16, 16, 128>}]} {
    %c16_i32 = arith.constant 16 : i32
    %0 = arith.muli %arg1, %c16_i32 : i32
    %c0 = arith.constant 0 : index
    %1 = arith.index_cast %0 : i32 to index
    %c0_0 = arith.constant 0 : index
    %c0_1 = arith.constant 0 : index
    %2 = vector.load %arg2[%c0, %1, %c0_0, %c0_1] : memref<1x18x18x4xbf16, #tpu.memory_space<vmem>>, vector<1x18x18x4xbf16>
    %3 = vector.shape_cast %2 : vector<1x18x18x4xbf16> to vector<18x18x4xbf16>
    %cst = arith.constant 0.000000e+00 : f32
    %4 = vector.broadcast %cst : f32 to vector<256x128xf32>
    %5 = vector.extract_strided_slice %3 {offsets = [0, 0, 0], sizes = [16, 16, 4], strides = [1, 1, 1]} : vector<18x18x4xbf16> to vector<16x16x4xbf16>
    %6 = vector.shape_cast %5 : vector<16x16x4xbf16> to vector<256x4xbf16>
    %c0_2 = arith.constant 0 : index
    %c0_3 = arith.constant 0 : index
    %c0_4 = arith.constant 0 : index
    %7 = vector.load %arg3[%c0_2, %c0_3, %c0_4] : memref<9x4x128xbf16, #tpu.memory_space<vmem>>, vector<1x4x128xbf16>
    %8 = vector.shape_cast %7 : vector<1x4x128xbf16> to vector<4x128xbf16>
    %cst_5 = arith.constant dense<0.000000e+00> : vector<256x128xf32>
    %9 = tpu.matmul %6, %8, %cst_5 {dimension_numbers = #tpu.dot_dimension_numbers<[1], [0], [0], [1], [0, 0, 1, 1], [], []>} : vector<256x4xbf16>, vector<4x128xbf16>, vector<256x128xf32> -> vector<256x128xf32>
    %10 = arith.addf %4, %9 : vector<256x128xf32>
    %11 = vector.extract_strided_slice %3 {offsets = [0, 1, 0], sizes = [16, 16, 4], strides = [1, 1, 1]} : vector<18x18x4xbf16> to vector<16x16x4xbf16>
    %12 = vector.shape_cast %11 : vector<16x16x4xbf16> to vector<256x4xbf16>
    %c1 = arith.constant 1 : index
    %c0_6 = arith.constant 0 : index
    %c0_7 = arith.constant 0 : index
    %13 = vector.load %arg3[%c1, %c0_6, %c0_7] : memref<9x4x128xbf16, #tpu.memory_space<vmem>>, vector<1x4x128xbf16>
    %14 = vector.shape_cast %13 : vector<1x4x128xbf16> to vector<4x128xbf16>
    %cst_8 = arith.constant dense<0.000000e+00> : vector<256x128xf32>
    %15 = tpu.matmul %12, %14, %cst_8 {dimension_numbers = #tpu.dot_dimension_numbers<[1], [0], [0], [1], [0, 0, 1, 1], [], []>} : vector<256x4xbf16>, vector<4x128xbf16>, vector<256x128xf32> -> vector<256x128xf32>
    %16 = arith.addf %10, %15 : vector<256x128xf32>
    %17 = vector.extract_strided_slice %3 {offsets = [0, 2, 0], sizes = [16, 16, 4], strides = [1, 1, 1]} : vector<18x18x4xbf16> to vector<16x16x4xbf16>
    %18 = vector.shape_cast %17 : vector<16x16x4xbf16> to vector<256x4xbf16>
    %c2 = arith.constant 2 : index
    %c0_9 = arith.constant 0 : index
    %c0_10 = arith.constant 0 : index
    %19 = vector.load %arg3[%c2, %c0_9, %c0_10] : memref<9x4x128xbf16, #tpu.memory_space<vmem>>, vector<1x4x128xbf16>
    %20 = vector.shape_cast %19 : vector<1x4x128xbf16> to vector<4x128xbf16>
    %cst_11 = arith.constant dense<0.000000e+00> : vector<256x128xf32>
    %21 = tpu.matmul %18, %20, %cst_11 {dimension_numbers = #tpu.dot_dimension_numbers<[1], [0], [0], [1], [0, 0, 1, 1], [], []>} : vector<256x4xbf16>, vector<4x128xbf16>, vector<256x128xf32> -> vector<256x128xf32>
    %22 = arith.addf %16, %21 : vector<256x128xf32>
    %23 = vector.extract_strided_slice %3 {offsets = [1, 0, 0], sizes = [16, 16, 4], strides = [1, 1, 1]} : vector<18x18x4xbf16> to vector<16x16x4xbf16>
    %24 = vector.shape_cast %23 : vector<16x16x4xbf16> to vector<256x4xbf16>
    %c3 = arith.constant 3 : index
    %c0_12 = arith.constant 0 : index
    %c0_13 = arith.constant 0 : index
    %25 = vector.load %arg3[%c3, %c0_12, %c0_13] : memref<9x4x128xbf16, #tpu.memory_space<vmem>>, vector<1x4x128xbf16>
    %26 = vector.shape_cast %25 : vector<1x4x128xbf16> to vector<4x128xbf16>
    %cst_14 = arith.constant dense<0.000000e+00> : vector<256x128xf32>
    %27 = tpu.matmul %24, %26, %cst_14 {dimension_numbers = #tpu.dot_dimension_numbers<[1], [0], [0], [1], [0, 0, 1, 1], [], []>} : vector<256x4xbf16>, vector<4x128xbf16>, vector<256x128xf32> -> vector<256x128xf32>
    %28 = arith.addf %22, %27 : vector<256x128xf32>
    %29 = vector.extract_strided_slice %3 {offsets = [1, 1, 0], sizes = [16, 16, 4], strides = [1, 1, 1]} : vector<18x18x4xbf16> to vector<16x16x4xbf16>
    %30 = vector.shape_cast %29 : vector<16x16x4xbf16> to vector<256x4xbf16>
    %c4 = arith.constant 4 : index
    %c0_15 = arith.constant 0 : index
    %c0_16 = arith.constant 0 : index
    %31 = vector.load %arg3[%c4, %c0_15, %c0_16] : memref<9x4x128xbf16, #tpu.memory_space<vmem>>, vector<1x4x128xbf16>
    %32 = vector.shape_cast %31 : vector<1x4x128xbf16> to vector<4x128xbf16>
    %cst_17 = arith.constant dense<0.000000e+00> : vector<256x128xf32>
    %33 = tpu.matmul %30, %32, %cst_17 {dimension_numbers = #tpu.dot_dimension_numbers<[1], [0], [0], [1], [0, 0, 1, 1], [], []>} : vector<256x4xbf16>, vector<4x128xbf16>, vector<256x128xf32> -> vector<256x128xf32>
    %34 = arith.addf %28, %33 : vector<256x128xf32>
    %35 = vector.extract_strided_slice %3 {offsets = [1, 2, 0], sizes = [16, 16, 4], strides = [1, 1, 1]} : vector<18x18x4xbf16> to vector<16x16x4xbf16>
    %36 = vector.shape_cast %35 : vector<16x16x4xbf16> to vector<256x4xbf16>
    %c5 = arith.constant 5 : index
    %c0_18 = arith.constant 0 : index
    %c0_19 = arith.constant 0 : index
    %37 = vector.load %arg3[%c5, %c0_18, %c0_19] : memref<9x4x128xbf16, #tpu.memory_space<vmem>>, vector<1x4x128xbf16>
    %38 = vector.shape_cast %37 : vector<1x4x128xbf16> to vector<4x128xbf16>
    %cst_20 = arith.constant dense<0.000000e+00> : vector<256x128xf32>
    %39 = tpu.matmul %36, %38, %cst_20 {dimension_numbers = #tpu.dot_dimension_numbers<[1], [0], [0], [1], [0, 0, 1, 1], [], []>} : vector<256x4xbf16>, vector<4x128xbf16>, vector<256x128xf32> -> vector<256x128xf32>
    %40 = arith.addf %34, %39 : vector<256x128xf32>
    %41 = vector.extract_strided_slice %3 {offsets = [2, 0, 0], sizes = [16, 16, 4], strides = [1, 1, 1]} : vector<18x18x4xbf16> to vector<16x16x4xbf16>
    %42 = vector.shape_cast %41 : vector<16x16x4xbf16> to vector<256x4xbf16>
    %c6 = arith.constant 6 : index
    %c0_21 = arith.constant 0 : index
    %c0_22 = arith.constant 0 : index
    %43 = vector.load %arg3[%c6, %c0_21, %c0_22] : memref<9x4x128xbf16, #tpu.memory_space<vmem>>, vector<1x4x128xbf16>
    %44 = vector.shape_cast %43 : vector<1x4x128xbf16> to vector<4x128xbf16>
    %cst_23 = arith.constant dense<0.000000e+00> : vector<256x128xf32>
    %45 = tpu.matmul %42, %44, %cst_23 {dimension_numbers = #tpu.dot_dimension_numbers<[1], [0], [0], [1], [0, 0, 1, 1], [], []>} : vector<256x4xbf16>, vector<4x128xbf16>, vector<256x128xf32> -> vector<256x128xf32>
    %46 = arith.addf %40, %45 : vector<256x128xf32>
    %47 = vector.extract_strided_slice %3 {offsets = [2, 1, 0], sizes = [16, 16, 4], strides = [1, 1, 1]} : vector<18x18x4xbf16> to vector<16x16x4xbf16>
    %48 = vector.shape_cast %47 : vector<16x16x4xbf16> to vector<256x4xbf16>
    %c7 = arith.constant 7 : index
    %c0_24 = arith.constant 0 : index
    %c0_25 = arith.constant 0 : index
    %49 = vector.load %arg3[%c7, %c0_24, %c0_25] : memref<9x4x128xbf16, #tpu.memory_space<vmem>>, vector<1x4x128xbf16>
    %50 = vector.shape_cast %49 : vector<1x4x128xbf16> to vector<4x128xbf16>
    %cst_26 = arith.constant dense<0.000000e+00> : vector<256x128xf32>
    %51 = tpu.matmul %48, %50, %cst_26 {dimension_numbers = #tpu.dot_dimension_numbers<[1], [0], [0], [1], [0, 0, 1, 1], [], []>} : vector<256x4xbf16>, vector<4x128xbf16>, vector<256x128xf32> -> vector<256x128xf32>
    %52 = arith.addf %46, %51 : vector<256x128xf32>
    %53 = vector.extract_strided_slice %3 {offsets = [2, 2, 0], sizes = [16, 16, 4], strides = [1, 1, 1]} : vector<18x18x4xbf16> to vector<16x16x4xbf16>
    %54 = vector.shape_cast %53 : vector<16x16x4xbf16> to vector<256x4xbf16>
    %c8 = arith.constant 8 : index
    %c0_27 = arith.constant 0 : index
    %c0_28 = arith.constant 0 : index
    %55 = vector.load %arg3[%c8, %c0_27, %c0_28] : memref<9x4x128xbf16, #tpu.memory_space<vmem>>, vector<1x4x128xbf16>
    %56 = vector.shape_cast %55 : vector<1x4x128xbf16> to vector<4x128xbf16>
    %cst_29 = arith.constant dense<0.000000e+00> : vector<256x128xf32>
    %57 = tpu.matmul %54, %56, %cst_29 {dimension_numbers = #tpu.dot_dimension_numbers<[1], [0], [0], [1], [0, 0, 1, 1], [], []>} : vector<256x4xbf16>, vector<4x128xbf16>, vector<256x128xf32> -> vector<256x128xf32>
    %58 = arith.addf %52, %57 : vector<256x128xf32>
    %cst_30 = arith.constant 0.000000e+00 : f32
    %59 = vector.broadcast %cst_30 : f32 to vector<256x128xf32>
    %60 = arith.maximumf %58, %59 : vector<256x128xf32>
    %61 = vector.shape_cast %60 : vector<256x128xf32> to vector<16x16x128xf32>
    %c0_31 = arith.constant 0 : index
    %c0_32 = arith.constant 0 : index
    %c0_33 = arith.constant 0 : index
    %c0_34 = arith.constant 0 : index
    %62 = vector.load %arg4[%c0_31, %c0_32, %c0_33, %c0_34] : memref<1x16x16x128xf32, #tpu.memory_space<vmem>>, vector<1x16x16x128xf32>
    %63 = vector.shape_cast %62 : vector<1x16x16x128xf32> to vector<16x16x128xf32>
    %64 = vector.shape_cast %61 : vector<16x16x128xf32> to vector<1x16x16x128xf32>
    tpu.vector_store %arg4[%c0_31, %c0_32, %c0_33, %c0_34], %64 {strides = array<i32>} : memref<1x16x16x128xf32, #tpu.memory_space<vmem>>, vector<1x16x16x128xf32>,
    return
  }
  func.func @transform_0(%arg0: i32, %arg1: i32) -> (i32, i32, i32, i32) {
    %c0_i32 = arith.constant 0 : i32
    %c0_i32_0 = arith.constant 0 : i32
    %c0_i32_1 = arith.constant 0 : i32
    %c0_i32_2 = arith.constant 0 : i32
    return %arg0, %c0_i32, %c0_i32_0, %c0_i32_1 : i32, i32, i32, i32
  }
  func.func @transform_1(%arg0: i32, %arg1: i32) -> (i32, i32, i32) {
    %c0_i32 = arith.constant 0 : i32
    %c0_i32_0 = arith.constant 0 : i32
    %c0_i32_1 = arith.constant 0 : i32
    %c0_i32_2 = arith.constant 0 : i32
    return %c0_i32, %c0_i32_0, %c0_i32_1 : i32, i32, i32
  }
  func.func @transform_2(%arg0: i32, %arg1: i32) -> (i32, i32, i32, i32) {
    %c0_i32 = arith.constant 0 : i32
    %c0_i32_0 = arith.constant 0 : i32
    %c0_i32_1 = arith.constant 0 : i32
    return %arg0, %arg1, %c0_i32, %c0_i32_0 : i32, i32, i32, i32
  }
}

</mosaic_0001>

<bundles_post_ra>
// kernel: conv_act.1
= control target key start
LH: loop header
LB: loop body
LE: loop exit
PB: predicated region body
PF: predicated region fallthrough
CT: control target
= control target key end

     0   :  { %s2740_s9 = smov 0   ;;  %s2742_s10 = smov 0   ;;  %s3856_s0 = inlined_call_operand.vmem [shape: bf16[2,18,18,4], index: 0, kind: input, shape index: {}]   ;;  %s3857_s1 = inlined_call_operand.vmem [shape: bf16[9,4,128], index: 1, kind: input, shape index: {}]   ;;  %s3858_s2 = inlined_call_operand.vmem [shape: f32[2,16,16,128], index: 2, kind: output, shape index: {}]  }
   0x1   :  { %s2744_s11 = smov 0  }
   0x2 LB: > { %s24_s12 = sadd.s32 1, %s2719_s10  ;;  %p2398_p0 = scmp.ge.s32.totalorder %s2723_s11, 1  ;;  %s2723_s11 = sphi %s2744_s11, %s12_s11   ;;  %s2719_s10 = sphi %s2742_s10, %s3998_s10   ;;  %s2715_s9 = sphi %s2740_s9, %s3997_s9  }
   0x3   : > { %p26_p1 = scmp.ge.s32.totalorder %s24_s12, 2  ;;  %p126_p2 = scmp.lt.s32.totalorder %s2723_s11, 3 }
   0x5   : > { %s4000_s12 = smov (%p26_p1, %s24_s12), 0  ;;  %p127_p3 = pnand %p2398_p0, %p126_p2 }
   0x7   : > { %130 = sbr.rel (%p127_p3) target bundleno = 757 (0x2f5), region = 28 }
   0xc   : > { %v2402_v0 = vld [vmem:[%s3857_s1 + $0x2] sm:$0x3]  ;;  %vm715_vm0 = vcmask 1041408   ;;  %p153_p4 = scmp.lt.s32.totalorder %s2715_s9, 1  ;;  %v2515_v2 = vld [vmem:[%s3857_s1 + $0x4] sm:$0x3] }
   0xd   : > { %v717_v1 = vsel %vm715_vm0, %v2402_v0, 0  ;;  %v1258_v3 = vsel %vm715_vm0, %v2515_v2, 0  ;;  %v2532_v4 = vld [vmem:[%s3857_s1 + $0x6] sm:$0x3]  ;;  %v228_v5 = vld [vmem:[%s3857_s1] sm:$0x3] }
   0xe   : > { %2665 = vmatpush.bf16.msra.mxu1 %v717_v1  ;;  %2666 = vmatpush.bf16.msra.mxu2 %v717_v1  ;;  %s4002_s9 = smov (!%p153_p4, %s2715_s9), 1  ;;  %v2553_v6 = vld [vmem:[%s3857_s1 + $0x8] sm:$0x3]  ;;  %v1392_v7 = vsel %vm715_vm0, %v2532_v4, 0  ;;  %v937_v8 = vsel %vm715_vm0, %v228_v5, 0  ;;  %vm666_vm4 = vcmask 31744  }
   0xf   : > { %2667 = vmatpush.bf16.msra.mxu3 %v717_v1  ;;  %726 = vmatpush.bf16.msra.mxu0 %v717_v1  ;;  %s2668_s23 = smul.u32 216, %s4002_s9  ;;  %v1548_v9 = vsel %vm715_vm0, %v2553_v6, 0  ;;  %vm229_vm1 = vsmask.f32 3328  ;;  %vm230_vm2 = vsmask.f32 7440 }
  0x10   : > { %vm2811_vm3 = vmor %vm229_vm1, %vm230_vm2  ;;  %vm1044_vm5 = vcmask 1042432   ;;  %vm1045_vm6 = vcmask 1046532   ;;  %s2646_s7 = sshll.u32 %s4002_s9, 8 }
  0x11   : > { %s2784_s26 = scalar_lea.vmem %s3856_s0, %s2668_s23  ;;  %vm3114_vm7 = vmor %vm1044_vm5, %vm1045_vm6  ;;  %s3705_s14 = scalar_lea.vmem %s3858_s2, %s2646_s7 }
  0x12   : > { %1267 = vmatpush.bf16.msrb.mxu2 %v1258_v3  ;;  %946 = vmatpush.bf16.msrb.mxu1 %v937_v8  ;;  %v2787_v10 = vld [vmem:[%s2784_s26 + $0x30] sm:$0xf]  ;;  %v2790_v11 = vld [vmem:[%s2784_s26 + $0x34] sm:$0xf]  ;;  %v2793_v12 = vld [vmem:[%s2784_s26 + $0x38] sm:$0x1] }
  0x13   : > { %1401 = vmatpush.bf16.msrb.mxu3 %v1392_v7  ;;  %1557 = vmatpush.bf16.msrb.mxu0 %v1548_v9  ;;  %v329_v13 = vshrl.u32 %v2787_v10, 16  ;;  %v332_v14 = vshll.u32 %v2787_v10, 16  ;;  %v338_v15 = vshll.u32 %v2790_v11, 16  ;;  %v342_v16 = vshrl.u32 %v2790_v11, 16  ;;  %v198_v17 = vld [vmem:[%s2784_s26 + $0x60] sm:$0xf] }
  0x14   : > { %v348_v18 = vshll.u32 %v2793_v12, 16  ;;  %v2802_v19 = vld [vmem:[%s2784_s26 + $0x64] sm:$0xf]  ;;  %v200_v20 = vld [vmem:[%s2784_s26 + $0x68] sm:$0x1]  ;;  %v425_v21 = vshrl.u32 %v198_v17, 16 }
  0x15   : > { %v331_v22 = vrot.slane %v329_v13, 4  ;;  %v334_v23 = vrot.slane %v332_v14, 5  ;;  %v340_v24 = vrot.slane %v338_v15, 5  ;;  %v344_v25 = vrot.slane %v342_v16, 4  ;;  %v210_v26 = vld [vmem:[%s2784_s26 + $0x90] sm:$0xf] }
  0x16   : > { %v350_v27 = vrot.slane %v348_v18, 5  ;;  %v427_v28 = vrot.slane %v425_v21, 4  ;;  %v428_v29 = vshll.u32 %v198_v17, 16  ;;  %v434_v30 = vshll.u32 %v2802_v19, 16  ;;  %v211_v35 = vld [vmem:[%s2784_s26 + $0x94] sm:$0xf] }
  0x17   : > { %v335_v31 = vor.u32 %v334_v23, %v331_v22  ;;  %v345_v32 = vor.u32 %v344_v25, %v340_v24  ;;  %v438_v33 = vshrl.u32 %v2802_v19, 16  ;;  %v444_v34 = vshll.u32 %v200_v20, 16  ;;  %v212_v45 = vld [vmem:[%s2784_s26 + $0x98] sm:$0x1]  ;;  %v2821_v61 = vld [vmem:[%s2784_s26] sm:$0xf] }
  0x18   : > { %v430_v37 = vrot.slane %v428_v29, 5  ;;  %v436_v38 = vrot.slane %v434_v30, 5  ;;  %v521_v39 = vshrl.u32 %v210_v26, 16  ;;  %v524_v47 = vshll.u32 %v210_v26, 16  ;;  %v2828_v1 = vld [vmem:[%s2784_s26 + $0x4] sm:$0xf] }
  0x19   : > { %v336_v40 = vrot.slane %v335_v31, 4  ;;  %v346_v41 = vrot.slane %v345_v32, 4  ;;  %v440_v42 = vrot.slane %v438_v33, 4  ;;  %v446_v43 = vrot.slane %v444_v34, 5  ;;  %v2831_v2 = vld [vmem:[%s2784_s26 + $0x8] sm:$0x1] }
  0x1a   : > { %v431_v44 = vor.u32 %v430_v37, %v427_v28  ;;  %v523_v46 = vrot.slane %v521_v39, 4  ;;  %v530_v48 = vshll.u32 %v211_v35, 16  ;;  %v534_v52 = vshrl.u32 %v211_v35, 16  ;;  %v2847_v23 = vld [vmem:[%s2784_s26 + $0x3c] sm:$0xf] }
  0x1b   : > { %v341_v49 = vsel %vm2811_vm3, %v336_v40, %v340_v24  ;;  %v351_v50 = vsel %vm2811_vm3, %v346_v41, %v350_v27  ;;  %v441_v51 = vor.u32 %v440_v42, %v436_v38  ;;  %v526_v56 = vrot.slane %v524_v47, 5  ;;  %v2850_v24 = vld [vmem:[%s2784_s26 + $0x40] sm:$0xf]  ;;  %v2855_v29 = vld [vmem:[%s2784_s26 + $0x44] sm:$0x1] }
  0x1c   : > { %v626_v53 = vunpack.c.l.b16 %v341_v49  ;;  %v627_v54 = vunpack.c.l.b16 %v351_v50  ;;  %v432_v55 = vrot.slane %v431_v44, 4  ;;  %v532_v58 = vrot.slane %v530_v48, 5  ;;  %v2870_v47 = vld [vmem:[%s2784_s26 + $0x70] sm:$0xf] }
  0x1d   : > { %v442_v57 = vrot.slane %v441_v51, 4  ;;  %v536_v59 = vrot.slane %v534_v52, 4  ;;  %v540_v60 = vshll.u32 %v212_v45, 16  ;;  %v527_v0 = vor.u32 %v526_v56, %v523_v46  ;;  %v2877_v51 = vld [vmem:[%s2784_s26 + $0x74] sm:$0x1] }
  0x1e   : > { %v2823_v62 = vpack.c.b16 %v627_v54, %v626_v53  ;;  %v437_v63 = vsel %vm2811_vm3, %v432_v55, %v436_v38  ;;  %v233_v9 = vshrl.u32 %v2821_v61, 16  ;;  %v236_v13 = vshll.u32 %v2821_v61, 16  ;;  %v2863_v38 = vld [vmem:[%s2784_s26 + $0x6c] sm:$0xf] }
  0x1f   : > { %v447_v3 = vsel %vm2811_vm3, %v442_v57, %v446_v43  ;;  %v634_v4 = vunpack.c.l.b16 %v437_v63  ;;  %v537_v5 = vor.u32 %v536_v59, %v532_v58  ;;  %v542_v6 = vrot.slane %v540_v60, 5 }
  0x20   : > { %2407 = vmatmul.msk.bf16.vlgmr.msra.gmra.mxu1 %vm666_vm4, %v2823_v62  ;;  %v635_v7 = vunpack.c.l.b16 %v447_v3  ;;  %v528_v8 = vrot.slane %v527_v0, 4  ;;  %v242_v15 = vshll.u32 %v2828_v1, 16  ;;  %v246_v16 = vshrl.u32 %v2828_v1, 16 }
  0x21   : > { %v538_v14 = vrot.slane %v537_v5, 4  ;;  %v252_v17 = vshll.u32 %v2831_v2, 16  ;;  %v235_v21 = vrot.slane %v233_v9, 4  ;;  %v238_v22 = vrot.slane %v236_v13, 5  ;;  %v213_v5 = vld [vmem:[%s2784_s26 + $0x9c] sm:$0xf] }
  0x22   : > { %v2842_v18 = vpack.c.b16 %v635_v7, %v634_v4  ;;  %v533_v20 = vsel %vm2811_vm3, %v528_v8, %v532_v58  ;;  %v244_v27 = vrot.slane %v242_v15, 5  ;;  %v248_v28 = vrot.slane %v246_v16, 4  ;;  %v214_v9 = vld [vmem:[%s2784_s26 + $0xa0] sm:$0xf] }
  0x23   : > { %v543_v25 = vsel %vm2811_vm3, %v538_v14, %v542_v6  ;;  %v642_v26 = vunpack.c.l.b16 %v533_v20  ;;  %v239_v31 = vor.u32 %v238_v22, %v235_v21  ;;  %v254_v32 = vrot.slane %v252_v17, 5  ;;  %v215_v17 = vld [vmem:[%s2784_s26 + $0xa4] sm:$0x1] }
  0x24   : > { %3901 = vst [vmem:[#allocation2_spill] sm:$0xff] %v2842_v18  ;;  %2411 = vmatmul.msk.bf16.vlgmr.msra.gmra.mxu2 %vm666_vm4, %v2842_v18  ;;  %v643_v30 = vunpack.c.l.b16 %v543_v25  ;;  %v249_v33 = vor.u32 %v248_v28, %v244_v27  ;;  %v353_v34 = vshrl.u32 %v2847_v23, 16  ;;  %v356_v35 = vshll.u32 %v2847_v23, 16 }
  0x25   : > { %v362_v37 = vshll.u32 %v2850_v24, 16  ;;  %v240_v40 = vrot.slane %v239_v31, 4  ;;  %v366_v41 = vshrl.u32 %v2850_v24, 16  ;;  %v372_v42 = vshll.u32 %v2855_v29, 16 }
  0x26   : > { %v2865_v39 = vpack.c.b16 %v643_v30, %v642_v26  ;;  %v250_v43 = vrot.slane %v249_v33, 4  ;;  %v355_v44 = vrot.slane %v353_v34, 4  ;;  %v358_v45 = vrot.slane %v356_v35, 5  ;;  %v2895_v35 = vld [vmem:[%s2784_s26 + $0xc] sm:$0xf] }
  0x27   : > { %v364_v46 = vrot.slane %v362_v37, 5  ;;  %v245_v48 = vsel %vm2811_vm3, %v240_v40, %v244_v27  ;;  %v368_v49 = vrot.slane %v366_v41, 4  ;;  %v374_v50 = vrot.slane %v372_v42, 5 }
  0x28   : > { %3902 = vst [vmem:[#allocation3_spill] sm:$0xff] %v2865_v39  ;;  %2415 = vmatmul.msk.bf16.vlgmr.msra.gmra.mxu3 %vm666_vm4, %v2865_v39  ;;  %v449_v52 = vshrl.u32 %v2863_v38, 16  ;;  %v255_v53 = vsel %vm2811_vm3, %v250_v43, %v254_v32  ;;  %v618_v54 = vunpack.c.l.b16 %v245_v48  ;;  %v359_v55 = vor.u32 %v358_v45, %v355_v44  ;;  %v2902_v43 = vld [vmem:[%s2784_s26 + $0x10] sm:$0xf]  ;;  %v2905_v48 = vld [vmem:[%s2784_s26 + $0x14] sm:$0x1] }
  0x29   : > { %v452_v56 = vshll.u32 %v2863_v38, 16  ;;  %v619_v57 = vunpack.c.l.b16 %v255_v53  ;;  %v369_v58 = vor.u32 %v368_v49, %v364_v46  ;;  %v458_v60 = vshll.u32 %v2870_v47, 16  ;;  %v3082_v39 = vld [vmem:[%s2784_s26 + $0x2c] sm:$0x1] }
  0x2a   : > { %v451_v59 = vrot.slane %v449_v52, 4  ;;  %v360_v63 = vrot.slane %v359_v55, 4  ;;  %v462_v3 = vshrl.u32 %v2870_v47, 16  ;;  %v468_v4 = vshll.u32 %v2877_v51, 16 }
  0x2b   : > { %v454_v0 = vrot.slane %v452_v56, 5  ;;  %v650_v6 = vpack.c.b16 %v619_v57, %v618_v54  ;;  %v370_v7 = vrot.slane %v369_v58, 4  ;;  %v460_v8 = vrot.slane %v458_v60, 5  ;;  %v2915_v58 = vld [vmem:[%s2784_s26 + $0x48] sm:$0xf] }
  0x2c   : > { %v365_v13 = vsel %vm2811_vm3, %v360_v63, %v364_v46  ;;  %v464_v15 = vrot.slane %v462_v3, 4  ;;  %v470_v16 = vrot.slane %v468_v4, 5  ;;  %v545_v22 = vshrl.u32 %v213_v5, 16  ;;  %v2920_v3 = vld [vmem:[%s2784_s26 + $0x4c] sm:$0xf] }
  0x2d   : > { %v455_v14 = vor.u32 %v454_v0, %v451_v59  ;;  %2403 = vmatmul.msk.bf16.vlgmr.msra.gmra.mxu0 %vm666_vm4, %v650_v6  ;;  %v375_v20 = vsel %vm2811_vm3, %v370_v7, %v374_v50  ;;  %v628_v21 = vunpack.c.l.b16 %v365_v13  ;;  %v548_v25 = vshll.u32 %v213_v5, 16 }
  0x2e   : > { %v629_v26 = vunpack.c.l.b16 %v375_v20  ;;  %v465_v28 = vor.u32 %v464_v15, %v460_v8  ;;  %v554_v30 = vshll.u32 %v214_v9, 16  ;;  %v547_v31 = vrot.slane %v545_v22, 4  ;;  %v2927_v15 = vld [vmem:[%s2784_s26 + $0x50] sm:$0x1] }
  0x2f   : > { %v456_v27 = vrot.slane %v455_v14, 4  ;;  %v550_v32 = vrot.slane %v548_v25, 5  ;;  %v558_v33 = vshrl.u32 %v214_v9, 16  ;;  %v564_v34 = vshll.u32 %v215_v17, 16 }
  0x30   : > { %v2897_v37 = vpack.c.b16 %v629_v26, %v628_v21  ;;  %v466_v41 = vrot.slane %v465_v28, 4  ;;  %v556_v42 = vrot.slane %v554_v30, 5  ;;  %v257_v52 = vshrl.u32 %v2895_v35, 16  ;;  %v2938_v28 = vld [vmem:[%s2784_s26 + $0x78] sm:$0xf] }
  0x31   : > { %v461_v40 = vsel %vm2811_vm3, %v456_v27, %v460_v8  ;;  %v551_v45 = vor.u32 %v550_v32, %v547_v31  ;;  %v560_v46 = vrot.slane %v558_v33, 4  ;;  %v566_v50 = vrot.slane %v564_v34, 5  ;;  %v2942_v34 = vld [vmem:[%s2784_s26 + $0x7c] sm:$0xf] }
  0x32   : > { %v636_v44 = vunpack.c.l.b16 %v461_v40  ;;  %2408 = vmatmul.msk.bf16.gmra.mxu1 %vm666_vm4, %v2897_v37  ;;  %v471_v49 = vsel %vm2811_vm3, %v466_v41, %v470_v16  ;;  %v260_v53 = vshll.u32 %v2895_v35, 16  ;;  %v266_v57 = vshll.u32 %v2902_v43, 16 }
  0x33   : > { %v637_v54 = vunpack.c.l.b16 %v471_v49  ;;  %v552_v55 = vrot.slane %v551_v45, 4  ;;  %v561_v56 = vor.u32 %v560_v46, %v556_v42  ;;  %v259_v59 = vrot.slane %v257_v52, 4 }
  0x34   : > { %v262_v60 = vrot.slane %v260_v53, 5  ;;  %v270_v63 = vshrl.u32 %v2902_v43, 16  ;;  %v276_v0 = vshll.u32 %v2905_v48, 16  ;;  %v268_v7 = vrot.slane %v266_v57, 5 }
  0x35   : > { %v2922_v4 = vpack.c.b16 %v637_v54, %v636_v44  ;;  %v557_v5 = vsel %vm2811_vm3, %v552_v55, %v556_v42  ;;  %v562_v6 = vrot.slane %v561_v56, 4  ;;  %v377_v17 = vshrl.u32 %v2915_v58, 16 }
  0x36   : > { %v644_v8 = vunpack.c.l.b16 %v557_v5  ;;  %v263_v9 = vor.u32 %v262_v60, %v259_v59  ;;  %v272_v13 = vrot.slane %v270_v63, 4  ;;  %v278_v14 = vrot.slane %v276_v0, 5 }
  0x37   : > { %2412 = vmatmul.msk.bf16.gmra.mxu2 %vm666_vm4, %v2922_v4  ;;  %v567_v16 = vsel %vm2811_vm3, %v562_v6, %v566_v50  ;;  %v380_v20 = vshll.u32 %v2915_v58, 16  ;;  %v386_v21 = vshll.u32 %v2920_v3, 16  ;;  %v390_v27 = vshrl.u32 %v2920_v3, 16  ;;  %v2949_v50 = vld [vmem:[%s2784_s26 + $0x80] sm:$0x1] }
  0x38   : > { %v645_v22 = vunpack.c.l.b16 %v567_v16  ;;  %v264_v25 = vrot.slane %v263_v9, 4  ;;  %v273_v26 = vor.u32 %v272_v13, %v268_v7  ;;  %v379_v30 = vrot.slane %v377_v17, 4  ;;  %v2968_v16 = vld [vmem:[%s2784_s26 + $0xac] sm:$0xf]  ;;  %v2971_v17 = vld [vmem:[%s2784_s26 + $0xb0] sm:$0x1] }
  0x39   : > { %v382_v31 = vrot.slane %v380_v20, 5  ;;  %v388_v32 = vrot.slane %v386_v21, 5  ;;  %v396_v33 = vshll.u32 %v2927_v15, 16  ;;  %v392_v44 = vrot.slane %v390_v27, 4  ;;  %3905 = vst [vmem:[#allocation6_spill] sm:$0xff] %v2968_v16 }
  0x3a   : > { %v2944_v40 = vpack.c.b16 %v645_v22, %v644_v8  ;;  %v269_v41 = vsel %vm2811_vm3, %v264_v25, %v268_v7  ;;  %v274_v42 = vrot.slane %v273_v26, 4  ;;  %v473_v52 = vshrl.u32 %v2938_v28, 16  ;;  %v2961_v8 = vld [vmem:[%s2784_s26 + $0xa8] sm:$0xf]  ;;  %3906 = vst [vmem:[#allocation7_spill] sm:$0xff] %v2971_v17 }
  0x3b   : > { %v620_v45 = vunpack.c.l.b16 %v269_v41  ;;  %v383_v46 = vor.u32 %v382_v31, %v379_v30  ;;  %v398_v49 = vrot.slane %v396_v33, 5  ;;  %v393_v54 = vor.u32 %v392_v44, %v388_v32  ;;  %3904 = vst [vmem:[#allocation5_spill] sm:$0xff] %v2961_v8 }
  0x3c   : > { %3903 = vst [vmem:[#allocation4_spill] sm:$0xff] %v2944_v40  ;;  %2416 = vmatmul.msk.bf16.gmra.mxu3 %vm666_vm4, %v2944_v40  ;;  %v279_v53 = vsel %vm2811_vm3, %v274_v42, %v278_v14  ;;  %v476_v55 = vshll.u32 %v2938_v28, 16  ;;  %v482_v56 = vshll.u32 %v2942_v34, 16  ;;  %v475_v60 = vrot.slane %v473_v52, 4  ;;  %v2985_v52 = vld [vmem:[%s2784_s26 + $0x18] sm:$0xf] }
  0x3d   : > { %v621_v57 = vunpack.c.l.b16 %v279_v53  ;;  %v384_v59 = vrot.slane %v383_v46, 4  ;;  %v486_v63 = vshrl.u32 %v2942_v34, 16  ;;  %v394_v0 = vrot.slane %v393_v54, 4  ;;  %v3071_v40 = vld [vmem:[%s2784_s26 + $0x24] sm:$0xf] }
  0x3e   : > { %v478_v5 = vrot.slane %v476_v55, 5  ;;  %v484_v6 = vrot.slane %v482_v56, 5  ;;  %v492_v7 = vshll.u32 %v2949_v50, 16  ;;  %v569_v30 = vshrl.u32 %v2961_v8, 16  ;;  %v2990_v56 = vld [vmem:[%s2784_s26 + $0x1c] sm:$0xf] }
  0x3f   : > { %v2963_v9 = vpack.c.b16 %v621_v57, %v620_v45  ;;  %v389_v13 = vsel %vm2811_vm3, %v384_v59, %v388_v32  ;;  %v488_v14 = vrot.slane %v486_v63, 4  ;;  %v399_v20 = vsel %vm2811_vm3, %v394_v0, %v398_v49  ;;  %v2993_v57 = vld [vmem:[%s2784_s26 + $0x20] sm:$0x1] }
  0x40   : > { %v630_v21 = vunpack.c.l.b16 %v389_v13  ;;  %v479_v22 = vor.u32 %v478_v5, %v475_v60  ;;  %v494_v25 = vrot.slane %v492_v7, 5  ;;  %v631_v26 = vunpack.c.l.b16 %v399_v20 }
  0x41   : > { %2404 = vmatmul.msk.bf16.gmra.mxu0 %vm666_vm4, %v2963_v9  ;;  %v489_v27 = vor.u32 %v488_v14, %v484_v6  ;;  %v572_v31 = vshll.u32 %v2961_v8, 16  ;;  %v578_v33 = vshll.u32 %v2968_v16, 16  ;;  %v582_v41 = vshrl.u32 %v2968_v16, 16 }
  0x42   : > { %v480_v32 = vrot.slane %v479_v22, 4  ;;  %v588_v42 = vshll.u32 %v2971_v17, 16  ;;  %v2982_v44 = vpack.c.b16 %v631_v26, %v630_v21  ;;  %v571_v46 = vrot.slane %v569_v30, 4  ;;  %v3005_v26 = vld [vmem:[%s2784_s26 + $0x54] sm:$0xf] }
  0x43   : > { %v490_v45 = vrot.slane %v489_v27, 4  ;;  %v574_v49 = vrot.slane %v572_v31, 5  ;;  %v580_v54 = vrot.slane %v578_v33, 5  ;;  %v584_v55 = vrot.slane %v582_v41, 4  ;;  %v3049_v17 = vld [vmem:[%s2784_s26 + $0xb4] sm:$0xf] }
  0x44   : > { %3907 = vst [vmem:[#allocation8_spill] sm:$0xff] %v2982_v44  ;;  %v485_v53 = vsel %vm2811_vm3, %v480_v32, %v484_v6  ;;  %2409 = vmatmul.msk.bf16.gmra.mxu1 %vm666_vm4, %v2982_v44  ;;  %v590_v0 = vrot.slane %v588_v42, 5  ;;  %v281_v6 = vshrl.u32 %v2985_v52, 16  ;;  %v284_v13 = vshll.u32 %v2985_v52, 16  ;;  %v3010_v32 = vld [vmem:[%s2784_s26 + $0x58] sm:$0xf] }
  0x45   : > { %v495_v59 = vsel %vm2811_vm3, %v490_v45, %v494_v25  ;;  %v638_v60 = vunpack.c.l.b16 %v485_v53  ;;  %v575_v63 = vor.u32 %v574_v49, %v571_v46  ;;  %v585_v7 = vor.u32 %v584_v55, %v580_v54  ;;  %v3015_v46 = vld [vmem:[%s2784_s26 + $0x5c] sm:$0x1]  ;;  %3910 = vst [vmem:[#allocation11_spill] sm:$0xff] %v3049_v17 }
  0x46   : > { %v639_v5 = vunpack.c.l.b16 %v495_v59  ;;  %v290_v20 = vshll.u32 %v2990_v56, 16  ;;  %v294_v21 = vshrl.u32 %v2990_v56, 16  ;;  %v300_v22 = vshll.u32 %v2993_v57, 16 }
  0x47   : > { %v576_v14 = vrot.slane %v575_v63, 4  ;;  %v586_v27 = vrot.slane %v585_v7, 4  ;;  %v283_v30 = vrot.slane %v281_v6, 4  ;;  %v286_v31 = vrot.slane %v284_v13, 5  ;;  %v3025_v7 = vld [vmem:[%s2784_s26 + $0x84] sm:$0xf] }
  0x48   : > { %v3007_v25 = vpack.c.b16 %v639_v5, %v638_v60  ;;  %v292_v41 = vrot.slane %v290_v20, 5  ;;  %v296_v42 = vrot.slane %v294_v21, 4  ;;  %v302_v45 = vrot.slane %v300_v22, 5  ;;  %3908 = vst [vmem:[#allocation9_spill] sm:$0xff] %v3025_v7 }
  0x49   : > { %v581_v33 = vsel %vm2811_vm3, %v576_v14, %v580_v54  ;;  %v591_v49 = vsel %vm2811_vm3, %v586_v27, %v590_v0  ;;  %v287_v55 = vor.u32 %v286_v31, %v283_v30  ;;  %v401_v59 = vshrl.u32 %v3005_v26, 16  ;;  %v3032_v30 = vld [vmem:[%s2784_s26 + $0x88] sm:$0xf] }
  0x4a   : > { %2413 = vmatmul.msk.bf16.gmra.mxu2 %vm666_vm4, %v3007_v25  ;;  %v646_v53 = vunpack.c.l.b16 %v581_v33  ;;  %v647_v60 = vunpack.c.l.b16 %v591_v49  ;;  %v297_v63 = vor.u32 %v296_v42, %v292_v41  ;;  %v404_v54 = vshll.u32 %v3005_v26, 16  ;;  %v3037_v49 = vld [vmem:[%s2784_s26 + $0x8c] sm:$0x1] }
  0x4b   : > { %v410_v5 = vshll.u32 %v3010_v32, 16  ;;  %v288_v6 = vrot.slane %v287_v55, 4  ;;  %v403_v13 = vrot.slane %v401_v59, 4  ;;  %v414_v14 = vshrl.u32 %v3010_v32, 16 }
  0x4c   : > { %v420_v0 = vshll.u32 %v3015_v46, 16  ;;  %v3029_v20 = vpack.c.b16 %v647_v60, %v646_v53  ;;  %v298_v21 = vrot.slane %v297_v63, 4  ;;  %v406_v22 = vrot.slane %v404_v54, 5 }
  0x4d   : > { %v412_v27 = vrot.slane %v410_v5, 5  ;;  %v293_v31 = vsel %vm2811_vm3, %v288_v6, %v292_v41  ;;  %v416_v33 = vrot.slane %v414_v14, 4  ;;  %v497_v55 = vshrl.u32 %v3025_v7, 16 }
  0x4e   : > { %3909 = vst [vmem:[#allocation10_spill] sm:$0xff] %v3029_v20  ;;  %v422_v42 = vrot.slane %v420_v0, 5  ;;  %2417 = vmatmul.msk.bf16.gmra.mxu3 %vm666_vm4, %v3029_v20  ;;  %v303_v53 = vsel %vm2811_vm3, %v298_v21, %v302_v45  ;;  %v622_v59 = vunpack.c.l.b16 %v293_v31  ;;  %v407_v60 = vor.u32 %v406_v22, %v403_v13  ;;  %v3054_v22 = vld [vmem:[%s2784_s26 + $0xb8] sm:$0xf] }
  0x4f   : > { %v500_v63 = vshll.u32 %v3025_v7, 16  ;;  %v623_v54 = vunpack.c.l.b16 %v303_v53  ;;  %v417_v41 = vor.u32 %v416_v33, %v412_v27  ;;  %v499_v5 = vrot.slane %v497_v55, 4  ;;  %3911 = vst [vmem:[#allocation12_spill] sm:$0xff] %v3054_v22 }
  0x50   : > { %v506_v6 = vshll.u32 %v3032_v30, 16  ;;  %v408_v14 = vrot.slane %v407_v60, 4  ;;  %v510_v8 = vshrl.u32 %v3032_v30, 16  ;;  %v516_v20 = vshll.u32 %v3037_v49, 16  ;;  %v3059_v60 = vld [vmem:[%s2784_s26 + $0xbc] sm:$0x1] }
  0x51   : > { %v502_v0 = vrot.slane %v500_v63, 5  ;;  %v3051_v45 = vpack.c.b16 %v623_v54, %v622_v59  ;;  %v418_v21 = vrot.slane %v417_v41, 4  ;;  %3912 = vst [vmem:[#allocation13_spill] sm:$0xff] %v3059_v60  ;;  %v593_v54 = vshrl.u32 %v3049_v17, 16 }
  0x52   : > { %v508_v13 = vrot.slane %v506_v6, 5  ;;  %v413_v31 = vsel %vm2811_vm3, %v408_v14, %v412_v27  ;;  %v512_v55 = vrot.slane %v510_v8, 4  ;;  %v518_v53 = vrot.slane %v516_v20, 5 }
  0x53   : > { %v503_v33 = vor.u32 %v502_v0, %v499_v5  ;;  %2405 = vmatmul.msk.bf16.gmra.mxu0 %vm666_vm4, %v3051_v45  ;;  %v423_v59 = vsel %vm2811_vm3, %v418_v21, %v422_v42  ;;  %v632_v63 = vunpack.c.l.b16 %v413_v31  ;;  %v596_v41 = vshll.u32 %v3049_v17, 16 }
  0x54   : > { %v633_v6 = vunpack.c.l.b16 %v423_v59  ;;  %v513_v5 = vor.u32 %v512_v55, %v508_v13  ;;  %v602_v8 = vshll.u32 %v3054_v22, 16  ;;  %v595_v20 = vrot.slane %v593_v54, 4 }
  0x55   : > { %v504_v27 = vrot.slane %v503_v33, 4  ;;  %v598_v14 = vrot.slane %v596_v41, 5  ;;  %v606_v0 = vshrl.u32 %v3054_v22, 16  ;;  %v612_v16 = vshll.u32 %v3059_v60, 16  ;;  %v3078_v33 = vld [vmem:[%s2784_s26 + $0x28] sm:$0xf] }
  0x56   : > { %v3073_v42 = vpack.c.b16 %v633_v6, %v632_v63  ;;  %v514_v31 = vrot.slane %v513_v5, 4  ;;  %v604_v59 = vrot.slane %v602_v8, 5  ;;  %v1052_v55 = vrot.slane %v2831_v2, 5 }
  0x57   : > { %v509_v21 = vsel %vm2811_vm3, %v504_v27, %v508_v13  ;;  %v599_v54 = vor.u32 %v598_v14, %v595_v20  ;;  %v608_v41 = vrot.slane %v606_v0, 4  ;;  %v614_v6 = vrot.slane %v612_v16, 5 }
  0x58   : > { %3913 = vst [vmem:[#allocation14_spill] sm:$0xff] %v3073_v42  ;;  %v640_v17 = vunpack.c.l.b16 %v509_v21  ;;  %2410 = vmatmul.msk.bf16.gmra.mxu1 %vm666_vm4, %v3073_v42  ;;  %v519_v63 = vsel %vm2811_vm3, %v514_v31, %v518_v53  ;;  %v305_v13 = vshrl.u32 %v3071_v40, 16  ;;  %v308_v27 = vshll.u32 %v3071_v40, 16 }
  0x59   : > { %v641_v5 = vunpack.c.l.b16 %v519_v63  ;;  %v600_v8 = vrot.slane %v599_v54, 4  ;;  %v609_v60 = vor.u32 %v608_v41, %v604_v59  ;;  %v314_v2 = vshll.u32 %v3078_v33, 16  ;;  %v2588_v54 = vld [vmem:[%s3857_s1 + $0xc] sm:$0x3]  ;;  %v2609_v41 = vld [vmem:[%s3857_s1 + $0xe] sm:$0x3] }
  0x5a   : > { %v307_v20 = vrot.slane %v305_v13, 4  ;;  %v310_v14 = vrot.slane %v308_v27, 5  ;;  %v318_v0 = vshrl.u32 %v3078_v33, 16  ;;  %v324_v21 = vshll.u32 %v3082_v39, 16 }
  0x5b   : > { %v3093_v22 = vpack.c.b16 %v641_v5, %v640_v17  ;;  %v605_v16 = vsel %vm2811_vm3, %v600_v8, %v604_v59  ;;  %v610_v53 = vrot.slane %v609_v60, 4  ;;  %v316_v31 = vrot.slane %v314_v2, 5  ;;  %v2571_v17 = vld [vmem:[%s3857_s1 + $0xa] sm:$0x3]  ;;  %v2627_v60 = vld [vmem:[%s3857_s1 + $0x10] sm:$0x3] }
  0x5c   : > { %v648_v63 = vunpack.c.l.b16 %v605_v16  ;;  %v311_v13 = vor.u32 %v310_v14, %v307_v20  ;;  %v320_v27 = vrot.slane %v318_v0, 4  ;;  %v326_v7 = vrot.slane %v324_v21, 5 }
  0x5d   : > { %3914 = vst [vmem:[#allocation15_spill] sm:$0xff] %v3093_v22  ;;  %2414 = vmatmul.msk.bf16.gmra.mxu2 %vm666_vm4, %v3093_v22  ;;  %v615_v59 = vsel %vm2811_vm3, %v610_v53, %v614_v6  ;;  %v2499_v5 = vrot.slane %v2821_v61, 9  ;;  %v1049_v0 = vrot.slane %v2828_v1, 5  ;;  %v1822_v21 = vsel %vm715_vm0, %v2588_v54, 0 }
  0x5e   : > { %v649_v8 = vunpack.c.l.b16 %v615_v59  ;;  %v312_v2 = vrot.slane %v311_v13, 4  ;;  %v321_v20 = vor.u32 %v320_v27, %v316_v31  ;;  %v1978_v16 = vsel %vm715_vm0, %v2609_v41, 0  ;;  %1831 = vmatpush.bf16.msra.mxu2 %v1822_v21  ;;  %v2648_v21 = vld [vmem:[%s2784_s26 + $0xc] sm:$0xff] }
  0x5f   : > { %v1688_v22 = vsel %vm715_vm0, %v2571_v17, 0  ;;  %v2118_v6 = vsel %vm715_vm0, %v2627_v60, 0  ;;  %v1050_v27 = vsel %vm3114_vm7, %v2499_v5, %v1049_v0  ;;  %1987 = vmatpush.bf16.msra.mxu3 %v1978_v16  ;;  %v1051_v54 = vrot.slane %v1049_v0, 4 }
  0x60   : > { %v3123_v53 = vpack.c.b16 %v649_v8, %v648_v63  ;;  %v317_v61 = vsel %vm2811_vm3, %v312_v2, %v316_v31  ;;  %v322_v13 = vrot.slane %v321_v20, 4  ;;  %1697 = vmatpush.bf16.msra.mxu1 %v1688_v22  ;;  %2127 = vmatpush.bf16.msra.mxu0 %v2118_v6  ;;  %v2500_v41 = vrot.slane %v2895_v35, 9  ;;  %v2647_v22 = vld [vmem:[%s2784_s26] sm:$0xff]  ;;  %v3160_v6 = vld [vmem:[%s2784_s26 + $0x18] sm:$0xff] }
  0x61   : > { %v624_v1 = vunpack.c.l.b16 %v317_v61  ;;  %v1161_v31 = vunpack.c.l.b16 %v1050_v27  ;;  %v1056_v17 = vrot.slane %v2902_v43, 5  ;;  %v1059_v60 = vrot.slane %v2905_v48, 5 }
  0x62   : > { %2418 = vmatmul.msk.bf16.gmra.mxu3 %vm666_vm4, %v3123_v53  ;;  %v327_v63 = vsel %vm2811_vm3, %v322_v13, %v326_v7  ;;  %v1053_v5 = vsel %vm3114_vm7, %v1051_v54, %v1052_v55  ;;  %v1063_v16 = vrot.slane %v2990_v56, 5  ;;  %v2501_v61 = vrot.slane %v2985_v52, 9 }
  0x63   : > { %v625_v59 = vunpack.c.l.b16 %v327_v63  ;;  %v1162_v8 = vunpack.c.l.b16 %v1053_v5  ;;  %v1057_v35 = vsel %vm3114_vm7, %v2500_v41, %v1056_v17  ;;  %v1058_v2 = vrot.slane %v1056_v17, 4  ;;  %v3180_v41 = vld [vmem:[%s2784_s26 + $0x24] sm:$0xff] }
  0x64   : > { %v1163_v7 = vunpack.c.l.b16 %v1057_v35  ;;  %v1065_v13 = vrot.slane %v1063_v16, 4  ;;  %v1066_v27 = vrot.slane %v2993_v57, 5  ;;  %v1070_v57 = vrot.slane %v3078_v33, 5 }
  0x65   : > { %v3141_v20 = vpack.c.b16 %v625_v59, %v624_v1  ;;  %v1193_v0 = vpack.c.b16 %v1162_v8, %v1161_v31  ;;  %v1060_v43 = vsel %vm3114_vm7, %v1058_v2, %v1059_v60  ;;  %v2502_v63 = vrot.slane %v3071_v40, 9  ;;  %v3202_v8 = vld [vmem:[%s2784_s26 + $0x30] sm:$0xff] }
  0x66   : > { %v1164_v48 = vunpack.c.l.b16 %v1060_v43  ;;  %v1067_v56 = vsel %vm3114_vm7, %v1065_v13, %v1066_v27  ;;  %v1072_v31 = vrot.slane %v1070_v57, 4  ;;  %v1073_v17 = vrot.slane %v3082_v39, 5  ;;  %v3230_v27 = vld [vmem:[%s2784_s26 + $0x3c] sm:$0xff] }
  0x67   : > { %2406 = vmatmul.msk.bf16.gmra.mxu0 %vm666_vm4, %v3141_v20  ;;  %v1166_v54 = vunpack.c.l.b16 %v1067_v56  ;;  %v1071_v60 = vsel %vm3114_vm7, %v2502_v63, %v1070_v57  ;;  %v1077_v39 = vrot.slane %v2790_v11, 5  ;;  %v2503_v35 = vrot.slane %v2787_v10, 9 }
  0x68   : > { %2483 = vmatmul.msk.bf16.vlgmr.msrb.gmra.mxu1 %vm666_vm4, %v2647_v22  ;;  %v3148_v55 = vpack.c.b16 %v1164_v48, %v1163_v7  ;;  %v1074_v33 = vsel %vm3114_vm7, %v1072_v31, %v1073_v17  ;;  %v1167_v59 = vunpack.c.l.b16 %v1071_v60  ;;  %v1080_v7 = vrot.slane %v2793_v12, 5 }
  0x69   : > { %v1168_v5 = vunpack.c.l.b16 %v1074_v33  ;;  %v1079_v2 = vrot.slane %v1077_v39, 4  ;;  %v1084_v13 = vrot.slane %v2850_v24, 5  ;;  %v2504_v56 = vrot.slane %v2847_v23, 9 }
  0x6b   : > { %v3194_v40 = vpack.c.b16 %v1168_v5, %v1167_v59  ;;  %v1081_v11 = vsel %vm3114_vm7, %v1079_v2, %v1080_v7  ;;  %v1085_v24 = vsel %vm3114_vm7, %v2504_v56, %v1084_v13  ;;  %v1091_v5 = vrot.slane %v2920_v3, 5 }
  0x6c   : > { %v1171_v23 = vunpack.c.l.b16 %v1085_v24  ;;  %v2505_v7 = vrot.slane %v2915_v58, 9  ;;  %v1098_v24 = vrot.slane %v3010_v32, 5 }
  0x6d   : > { %2516 = vmatmul.msk.bf16.vlgmr.msrb.gmra.mxu2 %vm666_vm4, %v1193_v0  ;;  %v1078_v0 = vsel %vm3114_vm7, %v2503_v35, %v1077_v39  ;;  %v3264_v35 = vld [vmem:[%s2784_s26 + $0x48] sm:$0xff] }
  0x6e   : > { %v1169_v48 = vunpack.c.l.b16 %v1078_v0  ;;  %3919 = vst [vmem:[#allocation18_spill] sm:$0xff] %v3264_v35  ;;  %v1093_v0 = vrot.slane %v1091_v5, 4 }
  0x72   : > { %2537 = vmatmul.msk.bf16.vlgmr.msrb.gmra.mxu3 %vm666_vm4, %v2648_v21 }
  0x77   : > { %2554 = vmatmul.msk.bf16.vlgmr.msrb.gmra.mxu0 %vm666_vm4, %v2963_v9  ;;  %v1064_v9 = vsel %vm3114_vm7, %v2501_v61, %v1063_v16 }
  0x78   : > { %2484 = vmatmul.msk.bf16.gmra.mxu1 %vm666_vm4, %v2648_v21  ;;  %v1165_v1 = vunpack.c.l.b16 %v1064_v9  ;;  %v1170_v21 = vunpack.c.l.b16 %v1081_v11  ;;  %v1094_v11 = vrot.slane %v2927_v15, 5 }
  0x7a   : > { %v3174_v52 = vpack.c.b16 %v1166_v54, %v1165_v1  ;;  %v3222_v12 = vpack.c.b16 %v1170_v21, %v1169_v48  ;;  %v1086_v1 = vrot.slane %v1084_v13, 4  ;;  %v1087_v54 = vrot.slane %v2855_v29, 5 }
  0x7b   : > { %v1092_v21 = vsel %vm3114_vm7, %v2505_v7, %v1091_v5  ;;  %v1095_v13 = vsel %vm3114_vm7, %v1093_v0, %v1094_v11  ;;  %v2506_v5 = vrot.slane %v3005_v26, 9  ;;  %v1100_v7 = vrot.slane %v1098_v24, 4 }
  0x7c   : > { %v1088_v63 = vsel %vm3114_vm7, %v1086_v1, %v1087_v54  ;;  %v1173_v56 = vunpack.c.l.b16 %v1092_v21  ;;  %v1174_v1 = vunpack.c.l.b16 %v1095_v13  ;;  %v1101_v0 = vrot.slane %v3015_v46, 5 }
  0x7d   : > { %2517 = vmatmul.msk.bf16.gmra.mxu2 %vm666_vm4, %v3148_v55  ;;  %v1172_v60 = vunpack.c.l.b16 %v1088_v63  ;;  %v1099_v32 = vsel %vm3114_vm7, %v2506_v5, %v1098_v24  ;;  %v1105_v5 = vrot.slane %v2802_v19, 5 }
  0x7e   : > { %v3288_v54 = vpack.c.b16 %v1174_v1, %v1173_v56  ;;  %v1102_v13 = vsel %vm3114_vm7, %v1100_v7, %v1101_v0  ;;  %v1175_v56 = vunpack.c.l.b16 %v1099_v32  ;;  %v2693_v32 = vld [vmem:[%s2784_s26 + $0x68] sm:$0x1] }
  0x7f   : > { %v3254_v33 = vpack.c.b16 %v1172_v60, %v1171_v23  ;;  %v3298_v60 = vld [vmem:[%s2784_s26 + $0x54] sm:$0xff]  ;;  %v1176_v46 = vunpack.c.l.b16 %v1102_v13  ;;  %v1108_v13 = vrot.slane %v2693_v32, 5 }
  0x80   : > { %3922 = vst [vmem:[#allocation21_spill] sm:$0xff] %v3288_v54 }
  0x81   : > { %3923 = vst [vmem:[#allocation22_spill] sm:$0xff] %v3298_v60 }
  0x82   : > { %2538 = vmatmul.msk.bf16.gmra.mxu3 %vm666_vm4, %v3160_v6 }
  0x87   : > { %2555 = vmatmul.msk.bf16.gmra.mxu0 %vm666_vm4, %v3051_v45 }
  0x88   : > { %2485 = vmatmul.msk.bf16.gmra.mxu1 %vm666_vm4, %v3160_v6 }
  0x8d   : > { %2518 = vmatmul.msk.bf16.gmra.mxu2 %vm666_vm4, %v3174_v52 }
  0x92   : > { %2539 = vmatmul.msk.bf16.gmra.mxu3 %vm666_vm4, %v3180_v41 }
  0x97   : > { %2556 = vmatmul.msk.bf16.gmra.mxu0 %vm666_vm4, %v3141_v20 }
  0x98   : > { %2486 = vmatmul.msk.bf16.gmra.mxu1 %vm666_vm4, %v3180_v41 }
  0x9d   : > { %v3197_v22 = vpop.f32.mrf.mxu1  ;;  %2519 = vmatmul.msk.bf16.gmra.mxu2 %vm666_vm4, %v3194_v40 }
  0xa2   : > { %2540 = vmatmul.msk.bf16.gmra.mxu3 %vm666_vm4, %v3202_v8 }
  0xa5   : > { %v3212_v43 = vpop.f32.mrf.mxu1 }
  0xa7   : > { %v3214_v16 = vpop.f32.mrf.mxu2  ;;  %2557 = vmatmul.msk.bf16.gmra.mxu0 %vm666_vm4, %v2823_v62 }
  0xa8   : > { %2487 = vmatmul.msk.bf16.gmra.mxu1 %vm666_vm4, %v3202_v8 }
  0xaa   : > { %v3220_v10 = vpop.f32.mrf.mxu0 }
  0xab   : > { %v3224_v61 = vpop.f32.mrf.mxu3 }
  0xac   : > { %3917 = vst [vmem:[#allocation16_spill] sm:$0xff] %v3224_v61 }
  0xad   : > { %2520 = vmatmul.msk.bf16.gmra.mxu2 %vm666_vm4, %v3222_v12 }
  0xaf   : > { %v3232_v9 = vpop.f32.mrf.mxu1  ;;  %v3236_v57 = vpop.f32.mrf.mxu2 }
  0xb2   : > { %2541 = vmatmul.msk.bf16.gmra.mxu3 %vm666_vm4, %v3230_v27  ;;  %v3244_v31 = vpop.f32.mrf.mxu0 }
  0xb3   : > { %v3246_v17 = vpop.f32.mrf.mxu3 }
  0xb4   : > { %3918 = vst [vmem:[#allocation17_spill] sm:$0xff] %v3246_v17 }
  0xb7   : > { %2558 = vmatmul.msk.bf16.gmra.mxu0 %vm666_vm4, %v2897_v37  ;;  %v3250_v29 = vpop.f32.mrf.mxu1 }
  0xb8   : > { %2488 = vmatmul.msk.bf16.gmra.mxu1 %vm666_vm4, %v3230_v27 }
  0xba   : > { %v3256_v59 = vpop.f32.mrf.mxu2 }
  0xbd   : > { %2521 = vmatmul.msk.bf16.gmra.mxu2 %vm666_vm4, %v3254_v33 }
  0xbe   : > { %v3259_v39 = vpop.f32.mrf.mxu0 }
  0xbf   : > { %v3266_v2 = vpop.f32.mrf.mxu3 }
  0xc0   : > { %3920 = vst [vmem:[#allocation19_spill] sm:$0xff] %v3266_v2 }
  0xc1   : > { %v3270_v48 = vpop.f32.mrf.mxu1 }
  0xc2   : > { %2542 = vmatmul.msk.bf16.gmra.mxu3 %vm666_vm4, %v3264_v35  ;;  %v3274_v3 = vpop.f32.mrf.mxu2 }
  0xc6   : > { %v3280_v58 = vpop.f32.mrf.mxu0 }
  0xc7   : > { %2559 = vmatmul.msk.bf16.gmra.mxu0 %vm666_vm4, %v2982_v44  ;;  %v3284_v15 = vpop.f32.mrf.mxu3 }
  0xc8   : > { %3921 = vst [vmem:[#allocation20_spill] sm:$0xff] %v3284_v15  ;;  %2489 = vmatmul.msk.bf16.gmra.mxu1 %vm666_vm4, %v3264_v35  ;;  %v3333_v15 = vld [vmem:[%s2784_s26 + $0x60] sm:$0xff] }
  0xc9   : > { %v3291_v63 = vpop.f32.mrf.mxu1  ;;  %3927 = vst [vmem:[#allocation26_spill] sm:$0xff] %v3333_v15 }
  0xcd   : > { %v3293_v23 = vpop.f32.mrf.mxu2  ;;  %2522 = vmatmul.msk.bf16.gmra.mxu2 %vm666_vm4, %v3288_v54 }
  0xd0   : > { %v3302_v11 = vpop.f32.mrf.mxu0 }
  0xd1   : > { %v3304_v21 = vpop.f32.mrf.mxu3 }
  0xd2   : > { %3924 = vst [vmem:[#allocation23_spill] sm:$0xff] %v3304_v21  ;;  %2543 = vmatmul.msk.bf16.gmra.mxu3 %vm666_vm4, %v3298_v60  ;;  %v3320_v21 = vpack.c.b16 %v1176_v46, %v1175_v56 }
  0xd4   : > { %3925 = vst [vmem:[#allocation24_spill] sm:$0xff] %v3320_v21 }
  0xd5   : > { %v3312_v26 = vpop.f32.mrf.mxu1  ;;  %v3314_v1 = vpop.f32.mrf.mxu2 }
  0xd7   : > { %2560 = vmatmul.msk.bf16.gmra.mxu0 %vm666_vm4, %v3073_v42  ;;  %v2694_v42 = vld [vmem:[%s2784_s26 + $0x60] sm:$0xf] }
  0xd8   : > { %2490 = vmatmul.msk.bf16.gmra.mxu1 %vm666_vm4, %v3298_v60  ;;  %v3322_v24 = vpop.f32.mrf.mxu0  ;;  %v2507_v2 = vrot.slane %v2694_v42, 9  ;;  %v1107_v60 = vrot.slane %v1105_v5, 4 }
  0xd9   : > { %v3325_v7 = vpop.f32.mrf.mxu3 }
  0xda   : > { %3926 = vst [vmem:[#allocation25_spill] sm:$0xff] %v3325_v7  ;;  %v1106_v19 = vsel %vm3114_vm7, %v2507_v2, %v1105_v5  ;;  %v1109_v46 = vsel %vm3114_vm7, %v1107_v60, %v1108_v13  ;;  %v1112_v60 = vrot.slane %v2870_v47, 5 }
  0xdb   : > { %v1177_v17 = vunpack.c.l.b16 %v1106_v19  ;;  %v1178_v42 = vunpack.c.l.b16 %v1109_v46  ;;  %v3366_v19 = vld [vmem:[%s2784_s26 + $0x6c] sm:$0xff] }
  0xdd   : > { %2523 = vmatmul.msk.bf16.gmra.mxu2 %vm666_vm4, %v3320_v21  ;;  %v3329_v0 = vpop.f32.mrf.mxu1  ;;  %v3355_v2 = vpack.c.b16 %v1178_v42, %v1177_v17  ;;  %v1114_v17 = vrot.slane %v1112_v60, 4 }
  0xdf   : > { %3929 = vst [vmem:[#allocation28_spill] sm:$0xff] %v3355_v2 }
  0xe0   : > { %v3336_v56 = vpop.f32.mrf.mxu2 }
  0xe2   : > { %2544 = vmatmul.msk.bf16.gmra.mxu3 %vm666_vm4, %v3333_v15 }
  0xe4   : > { %v3344_v7 = vpop.f32.mrf.mxu0 }
  0xe5   : > { %v3346_v32 = vpop.f32.mrf.mxu3  ;;  %v948_v21 = vpop.f32.mrf.mxu1 }
  0xe6   : > { %3928 = vst [vmem:[#allocation27_spill] sm:$0xff] %v3346_v32  ;;  %v949_v54 = vadd.f32 %v948_v21, %v3220_v10  ;;  %v1115_v21 = vrot.slane %v2877_v51, 5  ;;  %v2508_v32 = vrot.slane %v2863_v38, 9 }
  0xe7   : > { %2561 = vmatmul.msk.bf16.gmra.mxu0 %vm666_vm4, %v2842_v18 }
  0xe8   : > { %v3351_v44 = vpop.f32.mrf.mxu2  ;;  %2491 = vmatmul.msk.bf16.gmra.mxu1 %vm666_vm4, %v3333_v15  ;;  %v1113_v47 = vsel %vm3114_vm7, %v2508_v32, %v1112_v60 }
  0xe9   : > { %v1179_v61 = vunpack.c.l.b16 %v1113_v47 }
  0xec   : > { %v3358_v5 = vpop.f32.mrf.mxu0 }
  0xed   : > { %v3360_v13 = vpop.f32.mrf.mxu3  ;;  %2524 = vmatmul.msk.bf16.gmra.mxu2 %vm666_vm4, %v3355_v2  ;;  %v950_v10 = vpop.f32.mrf.mxu1 }
  0xee   : > { %3930 = vst [vmem:[#allocation29_spill] sm:$0xff] %v3360_v13  ;;  %v951_v46 = vadd.f32 %v950_v10, %v3244_v31  ;;  %v1116_v13 = vsel %vm3114_vm7, %v1114_v17, %v1115_v21  ;;  %v1119_v21 = vrot.slane %v2942_v34, 5 }
  0xef   : > { %v1180_v35 = vunpack.c.l.b16 %v1116_v13  ;;  %v1122_v13 = vrot.slane %v2949_v50, 5 }
  0xf0   : > { %v1269_v42 = vpop.f32.mrf.mxu2 }
  0xf1   : > { %v1349_v18 = vadd.f32 %v1269_v42, %v949_v54  ;;  %v3383_v10 = vpack.c.b16 %v1180_v35, %v1179_v61  ;;  %v3390_v42 = vld [vmem:[%s2784_s26 + $0x78] sm:$0xff] }
  0xf2   : > { %2545 = vmatmul.msk.bf16.gmra.mxu3 %vm666_vm4, %v3366_v19 }
  0xf4   : > { %v1559_v2 = vpop.f32.mrf.mxu0 }
  0xf5   : > { %v1403_v51 = vpop.f32.mrf.mxu3  ;;  %v953_v15 = vpop.f32.mrf.mxu1 }
  0xf6   : > { %v1483_v31 = vadd.f32 %v1403_v51, %v1349_v18  ;;  %v954_v38 = vadd.f32 %v953_v15, %v3259_v39 }
  0xf7   : > { %2562 = vmatmul.msk.bf16.gmra.mxu0 %vm666_vm4, %v2922_v4 }
  0xf8   : > { %v1271_v54 = vpop.f32.mrf.mxu2  ;;  %2492 = vmatmul.msk.bf16.gmra.mxu1 %vm666_vm4, %v3366_v19  ;;  %v3381_v32 = vadd.f32 %v1559_v2, %v1483_v31  ;;  %v2509_v2 = vrot.slane %v2938_v28, 9 }
  0xf9   : > { %v1350_v60 = vadd.f32 %v1271_v54, %v951_v46  ;;  %v1121_v46 = vrot.slane %v1119_v21, 4 }
  0xfa   : > { %v1120_v50 = vsel %vm3114_vm7, %v2509_v2, %v1119_v21 }
  0xfb   : > { %v1123_v51 = vsel %vm3114_vm7, %v1121_v46, %v1122_v13  ;;  %v1129_v46 = vrot.slane %v3037_v49, 5 }
  0xfc   : > { %v1561_v17 = vpop.f32.mrf.mxu0 }
  0xfd   : > { %v1405_v18 = vpop.f32.mrf.mxu3  ;;  %2525 = vmatmul.msk.bf16.gmra.mxu2 %vm666_vm4, %v3383_v10  ;;  %v955_v39 = vpop.f32.mrf.mxu1 }
  0xfe   : > { %v1484_v15 = vadd.f32 %v1405_v18, %v1350_v60  ;;  %v956_v47 = vadd.f32 %v955_v39, %v3280_v58  ;;  %v1181_v58 = vunpack.c.l.b16 %v1120_v50  ;;  %v1182_v18 = vunpack.c.l.b16 %v1123_v51  ;;  %v3416_v50 = vld [vmem:[%s2784_s26 + $0x84] sm:$0xff] }
 0x100   : > { %v1274_v61 = vpop.f32.mrf.mxu2  ;;  %v3394_v35 = vadd.f32 %v1561_v17, %v1484_v15  ;;  %v3409_v13 = vpack.c.b16 %v1182_v18, %v1181_v58  ;;  %v1126_v15 = vrot.slane %v3032_v30, 5 }
 0x101   : > { %v1351_v34 = vadd.f32 %v1274_v61, %v954_v38 }
 0x102   : > { %2546 = vmatmul.msk.bf16.gmra.mxu3 %vm666_vm4, %v3390_v42 }
 0x104   : > { %v1564_v31 = vpop.f32.mrf.mxu0 }
 0x105   : > { %v1408_v54 = vpop.f32.mrf.mxu3  ;;  %v958_v60 = vpop.f32.mrf.mxu1 }
 0x106   : > { %v1485_v28 = vadd.f32 %v1408_v54, %v1351_v34  ;;  %v959_v17 = vadd.f32 %v958_v60, %v3302_v11 }
 0x107   : > { %2563 = vmatmul.msk.bf16.gmra.mxu0 %vm666_vm4, %v3007_v25 }
 0x108   : > { %v1276_v38 = vpop.f32.mrf.mxu2  ;;  %2493 = vmatmul.msk.bf16.gmra.mxu1 %vm666_vm4, %v3390_v42  ;;  %v3407_v21 = vadd.f32 %v1564_v31, %v1485_v28  ;;  %v3931_v31 = vld [vmem:[#allocation9_spill] sm:$0xff] }
 0x109   : > { %v1352_v39 = vadd.f32 %v1276_v38, %v956_v47  ;;  %v2510_v54 = vrot.slane %v3931_v31, 9  ;;  %v1128_v47 = vrot.slane %v1126_v15, 4 }
 0x10b   : > { %v1127_v49 = vsel %vm3114_vm7, %v2510_v54, %v1126_v15  ;;  %v1130_v18 = vsel %vm3114_vm7, %v1128_v47, %v1129_v46  ;;  %v2695_v54 = vld [vmem:[%s2784_s26 + $0x94] sm:$0xf] }
 0x10c   : > { %v1566_v2 = vpop.f32.mrf.mxu0  ;;  %v1133_v47 = vrot.slane %v2695_v54, 5 }
 0x10d   : > { %v1410_v61 = vpop.f32.mrf.mxu3  ;;  %2526 = vmatmul.msk.bf16.gmra.mxu2 %vm666_vm4, %v3409_v13  ;;  %v960_v11 = vpop.f32.mrf.mxu1 }
 0x10e   : > { %v1486_v34 = vadd.f32 %v1410_v61, %v1352_v39  ;;  %v961_v51 = vadd.f32 %v960_v11, %v3322_v24  ;;  %v1183_v39 = vunpack.c.l.b16 %v1127_v49  ;;  %v1184_v61 = vunpack.c.l.b16 %v1130_v18 }
 0x110   : > { %v1279_v60 = vpop.f32.mrf.mxu2  ;;  %v3420_v58 = vadd.f32 %v1566_v2, %v1486_v34  ;;  %v3435_v31 = vpack.c.b16 %v1184_v61, %v1183_v39 }
 0x111   : > { %v1353_v30 = vadd.f32 %v1279_v60, %v959_v17  ;;  %v3933_v17 = vld [vmem:[#allocation15_spill] sm:$0xff] }
 0x112   : > { %3932 = vst [vmem:[#allocation9_spill] sm:$0xff] %v3420_v58  ;;  %2547 = vmatmul.msk.bf16.gmra.mxu3 %vm666_vm4, %v3416_v50 }
 0x113   : > { %3935 = vst [vmem:[#allocation31_spill] sm:$0xff] %v3435_v31 }
 0x114   : > { %v1569_v28 = vpop.f32.mrf.mxu0 }
 0x115   : > { %v1413_v24 = vpop.f32.mrf.mxu3  ;;  %v963_v38 = vpop.f32.mrf.mxu1 }
 0x116   : > { %v1487_v11 = vadd.f32 %v1413_v24, %v1353_v30  ;;  %v964_v2 = vadd.f32 %v963_v38, %v3344_v7  ;;  %v2696_v30 = vld [vmem:[%s2784_s26 + $0x98] sm:$0x1]  ;;  %v3442_v38 = vld [vmem:[%s2784_s26 + $0x90] sm:$0xff] }
 0x117   : > { %2564 = vmatmul.msk.bf16.gmra.mxu0 %vm666_vm4, %v3933_v17  ;;  %v1136_v49 = vrot.slane %v2696_v30, 5  ;;  %3936 = vst [vmem:[#allocation32_spill] sm:$0xff] %v3442_v38 }
 0x118   : > { %v1281_v34 = vpop.f32.mrf.mxu2  ;;  %2494 = vmatmul.msk.bf16.gmra.mxu1 %vm666_vm4, %v3416_v50  ;;  %v3433_v15 = vadd.f32 %v1569_v28, %v1487_v11  ;;  %v2697_v28 = vld [vmem:[%s2784_s26 + $0x90] sm:$0xf] }
 0x119   : > { %v1354_v46 = vadd.f32 %v1281_v34, %v961_v51  ;;  %v2511_v11 = vrot.slane %v2697_v28, 9  ;;  %v1135_v51 = vrot.slane %v1133_v47, 4 }
 0x11a   : > { %3934 = vst [vmem:[#allocation30_spill] sm:$0xff] %v3433_v15 }
 0x11b   : > { %v1134_v54 = vsel %vm3114_vm7, %v2511_v11, %v1133_v47  ;;  %v2698_v11 = vld [vmem:[%s2784_s26 + $0xa0] sm:$0xf] }
 0x11c   : > { %v1571_v60 = vpop.f32.mrf.mxu0 }
 0x11d   : > { %v1415_v7 = vpop.f32.mrf.mxu3  ;;  %2527 = vmatmul.msk.bf16.gmra.mxu2 %vm666_vm4, %v3435_v31  ;;  %v965_v18 = vpop.f32.mrf.mxu1  ;;  %v2700_v31 = vld [vmem:[%s2784_s26 + $0x9c] sm:$0xf] }
 0x11e   : > { %v1488_v24 = vadd.f32 %v1415_v7, %v1354_v46  ;;  %v966_v58 = vadd.f32 %v965_v18, %v3358_v5  ;;  %v1137_v46 = vsel %vm3114_vm7, %v1135_v51, %v1136_v49  ;;  %v1185_v18 = vunpack.c.l.b16 %v1134_v54 }
 0x11f   : > { %v1186_v28 = vunpack.c.l.b16 %v1137_v46  ;;  %v1140_v51 = vrot.slane %v2698_v11, 5  ;;  %v2699_v46 = vld [vmem:[%s2784_s26 + $0xa4] sm:$0x1] }
 0x120   : > { %v1284_v39 = vpop.f32.mrf.mxu2  ;;  %v3446_v61 = vadd.f32 %v1571_v60, %v1488_v24  ;;  %v3938_v60 = vld [vmem:[#allocation3_spill] sm:$0xff] }
 0x121   : > { %v1355_v34 = vadd.f32 %v1284_v39, %v964_v2  ;;  %v3460_v49 = vpack.c.b16 %v1186_v28, %v1185_v18 }
 0x122   : > { %3937 = vst [vmem:[#allocation33_spill] sm:$0xff] %v3446_v61  ;;  %2548 = vmatmul.msk.bf16.gmra.mxu3 %vm666_vm4, %v3442_v38 }
 0x123   : > { %3940 = vst [vmem:[#allocation35_spill] sm:$0xff] %v3460_v49 }
 0x124   : > { %v1574_v30 = vpop.f32.mrf.mxu0 }
 0x125   : > { %v1418_v7 = vpop.f32.mrf.mxu3  ;;  %v968_v5 = vpop.f32.mrf.mxu1 }
 0x126   : > { %v1489_v15 = vadd.f32 %v1418_v7, %v1355_v34  ;;  %v1143_v7 = vrot.slane %v2699_v46, 5 }
 0x127   : > { %2565 = vmatmul.msk.bf16.gmra.mxu0 %vm666_vm4, %v3938_v60  ;;  %v3467_v60 = vld [vmem:[%s2784_s26 + $0x9c] sm:$0xff] }
 0x128   : > { %v1286_v2 = vpop.f32.mrf.mxu2  ;;  %2495 = vmatmul.msk.bf16.gmra.mxu1 %vm666_vm4, %v3442_v38  ;;  %v3458_v47 = vadd.f32 %v1574_v30, %v1489_v15  ;;  %3941 = vst [vmem:[#allocation36_spill] sm:$0xff] %v3467_v60  ;;  %v2512_v38 = vrot.slane %v2700_v31, 9  ;;  %v1142_v15 = vrot.slane %v1140_v51, 4 }
 0x129   : > { %v1356_v24 = vadd.f32 %v1286_v2, %v966_v58  ;;  %v969_v58 = vadd.f32 %v968_v5, %v3197_v22  ;;  %v3943_v5 = vld [vmem:[#allocation4_spill] sm:$0xff] }
 0x12a   : > { %3939 = vst [vmem:[#allocation34_spill] sm:$0xff] %v3458_v47  ;;  %v1141_v2 = vsel %vm3114_vm7, %v2512_v38, %v1140_v51 }
 0x12b   : > { %v1187_v31 = vunpack.c.l.b16 %v1141_v2 }
 0x12c   : > { %v1576_v39 = vpop.f32.mrf.mxu0 }
 0x12d   : > { %v1420_v54 = vpop.f32.mrf.mxu3  ;;  %2528 = vmatmul.msk.bf16.gmra.mxu2 %vm666_vm4, %v3460_v49  ;;  %v970_v34 = vpop.f32.mrf.mxu1 }
 0x12e   : > { %v1490_v61 = vadd.f32 %v1420_v54, %v1356_v24  ;;  %v1144_v24 = vsel %vm3114_vm7, %v1142_v15, %v1143_v7  ;;  %v3946_v15 = vld [vmem:[#allocation6_spill] sm:$0xff] }
 0x12f   : > { %v1188_v47 = vunpack.c.l.b16 %v1144_v24  ;;  %v3947_v24 = vld [vmem:[#allocation7_spill] sm:$0xff] }
 0x130   : > { %v1289_v30 = vpop.f32.mrf.mxu2  ;;  %v3471_v18 = vadd.f32 %v1576_v39, %v1490_v61  ;;  %v971_v61 = vadd.f32 %v970_v34, %v3212_v43  ;;  %v3493_v34 = vld [vmem:[%s2784_s26 + $0xa8] sm:$0xff] }
 0x131   : > { %v1357_v28 = vadd.f32 %v1289_v30, %v969_v58  ;;  %v3486_v7 = vpack.c.b16 %v1188_v47, %v1187_v31  ;;  %v1147_v58 = vrot.slane %v3946_v15, 5  ;;  %3948 = vst [vmem:[#allocation6_spill] sm:$0xff] %v3493_v34 }
 0x132   : > { %3942 = vst [vmem:[#allocation37_spill] sm:$0xff] %v3471_v18  ;;  %2549 = vmatmul.msk.bf16.gmra.mxu3 %vm666_vm4, %v3467_v60  ;;  %v3949_v18 = vld [vmem:[#allocation5_spill] sm:$0xff] }
 0x133   : > { %3945 = vst [vmem:[#allocation39_spill] sm:$0xff] %v3486_v7 }
 0x134   : > { %v1579_v11 = vpop.f32.mrf.mxu0 }
 0x135   : > { %v1423_v54 = vpop.f32.mrf.mxu3  ;;  %v973_v46 = vpop.f32.mrf.mxu1 }
 0x136   : > { %v1491_v22 = vadd.f32 %v1423_v54, %v1357_v28  ;;  %v1150_v54 = vrot.slane %v3947_v24, 5 }
 0x137   : > { %2566 = vmatmul.msk.bf16.gmra.mxu0 %vm666_vm4, %v3943_v5  ;;  %v2513_v5 = vrot.slane %v3949_v18, 9 }
 0x138   : > { %v1291_v39 = vpop.f32.mrf.mxu2  ;;  %2496 = vmatmul.msk.bf16.gmra.mxu1 %vm666_vm4, %v3467_v60  ;;  %v3484_v38 = vadd.f32 %v1579_v11, %v1491_v22  ;;  %v1149_v11 = vrot.slane %v1147_v58, 4  ;;  %v974_v22 = vadd.f32 %v973_v46, %v3232_v9 }
 0x139   : > { %v1358_v51 = vadd.f32 %v1291_v39, %v971_v61  ;;  %v1148_v39 = vsel %vm3114_vm7, %v2513_v5, %v1147_v58  ;;  %v3511_v5 = vld [vmem:[%s2784_s26 + $0xc0] sm:$0xf] }
 0x13a   : > { %3944 = vst [vmem:[#allocation38_spill] sm:$0xff] %v3484_v38  ;;  %v1189_v24 = vunpack.c.l.b16 %v1148_v39  ;;  %v3951_v38 = vld [vmem:[#allocation10_spill] sm:$0xff]  ;;  %v1516_v39 = vshrl.u32 %v3511_v5, 16 }
 0x13b   : > { %3952 = vst [vmem:[#allocation5_spill] sm:$0xff] %v3511_v5 }
 0x13c   : > { %v1581_v30 = vpop.f32.mrf.mxu0 }
 0x13d   : > { %v1425_v2 = vpop.f32.mrf.mxu3  ;;  %2529 = vmatmul.msk.bf16.gmra.mxu2 %vm666_vm4, %v3486_v7  ;;  %v975_v28 = vpop.f32.mrf.mxu1 }
 0x13e   : > { %v1492_v43 = vadd.f32 %v1425_v2, %v1358_v51  ;;  %v1151_v51 = vsel %vm3114_vm7, %v1149_v11, %v1150_v54 }
 0x13f   : > { %v1190_v9 = vunpack.c.l.b16 %v1151_v51 }
 0x140   : > { %v1294_v47 = vpop.f32.mrf.mxu2  ;;  %v3497_v31 = vadd.f32 %v1581_v30, %v1492_v43  ;;  %v976_v30 = vadd.f32 %v975_v28, %v3250_v29  ;;  %v1519_v29 = vshll.u32 %v3511_v5, 16 }
 0x141   : > { %v1359_v61 = vadd.f32 %v1294_v47, %v974_v22  ;;  %v3515_v11 = vpack.c.b16 %v1190_v9, %v1189_v24  ;;  %v3518_v22 = vld [vmem:[%s2784_s26 + $0xc4] sm:$0xf]  ;;  %v3956_v47 = vld [vmem:[#allocation12_spill] sm:$0xff]  ;;  %v3957_v24 = vld [vmem:[#allocation13_spill] sm:$0xff] }
 0x142   : > { %3950 = vst [vmem:[#allocation7_spill] sm:$0xff] %v3497_v31  ;;  %2550 = vmatmul.msk.bf16.gmra.mxu3 %vm666_vm4, %v3493_v34  ;;  %v1525_v28 = vshll.u32 %v3518_v22, 16  ;;  %v1157_v9 = vrot.slane %v3957_v24, 5  ;;  %v1521_v7 = vrot.slane %v1519_v29, 5 }
 0x143   : > { %3954 = vst [vmem:[#allocation41_spill] sm:$0xff] %v3515_v11 }
 0x144   : > { %v1584_v15 = vpop.f32.mrf.mxu0  ;;  %3955 = vst [vmem:[#allocation42_spill] sm:$0xff] %v3518_v22 }
 0x145   : > { %v1428_v18 = vpop.f32.mrf.mxu3  ;;  %v978_v2 = vpop.f32.mrf.mxu1 }
 0x146   : > { %v1493_v46 = vadd.f32 %v1428_v18, %v1359_v61  ;;  %v1154_v61 = vrot.slane %v3956_v47, 5  ;;  %v1529_v18 = vshrl.u32 %v3518_v22, 16  ;;  %v979_v5 = vadd.f32 %v978_v2, %v3270_v48 }
 0x147   : > { %2567 = vmatmul.msk.bf16.gmra.mxu0 %vm666_vm4, %v3951_v38  ;;  %v1518_v38 = vrot.slane %v1516_v39, 4  ;;  %v1527_v22 = vrot.slane %v1525_v28, 5 }
 0x148   : > { %v1296_v43 = vpop.f32.mrf.mxu2  ;;  %2497 = vmatmul.msk.bf16.gmra.mxu1 %vm666_vm4, %v3493_v34  ;;  %v3513_v58 = vadd.f32 %v1584_v15, %v1493_v46  ;;  %v1531_v60 = vrot.slane %v1529_v18, 4 }
 0x149   : > { %v1360_v54 = vadd.f32 %v1296_v43, %v976_v30  ;;  %v3529_v30 = vld [vmem:[%s2784_s26 + $0xb4] sm:$0xff]  ;;  %v3958_v43 = vld [vmem:[#allocation11_spill] sm:$0xff]  ;;  %v1522_v2 = vor.u32 %v1521_v7, %v1518_v38 }
 0x14a   : > { %3953 = vst [vmem:[#allocation40_spill] sm:$0xff] %v3513_v58  ;;  %v2514_v47 = vrot.slane %v3958_v43, 9  ;;  %v1156_v58 = vrot.slane %v1154_v61, 4  ;;  %v1532_v39 = vor.u32 %v1531_v60, %v1527_v22 }
 0x14c   : > { %v1586_v51 = vpop.f32.mrf.mxu0  ;;  %v1533_v38 = vrot.slane %v1532_v39, 4 }
 0x14d   : > { %v1430_v31 = vpop.f32.mrf.mxu3  ;;  %2530 = vmatmul.msk.bf16.gmra.mxu2 %vm666_vm4, %v3515_v11  ;;  %v980_v15 = vpop.f32.mrf.mxu1  ;;  %v3536_v11 = vld [vmem:[%s2784_s26 + $0xc8] sm:$0x1] }
 0x14e   : > { %v1494_v46 = vadd.f32 %v1430_v31, %v1360_v54  ;;  %v1155_v31 = vsel %vm3114_vm7, %v2514_v47, %v1154_v61  ;;  %v1158_v54 = vsel %vm3114_vm7, %v1156_v58, %v1157_v9  ;;  %v1535_v29 = vshll.u32 %v3536_v11, 16 }
 0x14f   : > { %v1191_v18 = vunpack.c.l.b16 %v1155_v31  ;;  %v981_v24 = vadd.f32 %v980_v15, %v3291_v63  ;;  %v1523_v58 = vrot.slane %v1522_v2, 4 }
 0x150   : > { %v1299_v34 = vpop.f32.mrf.mxu2  ;;  %v3533_v49 = vadd.f32 %v1586_v51, %v1494_v46  ;;  %v1537_v60 = vrot.slane %v1535_v29, 5 }
 0x151   : > { %v1361_v17 = vadd.f32 %v1299_v34, %v979_v5  ;;  %v1192_v34 = vunpack.c.l.b16 %v1158_v54  ;;  %v3561_v54 = vld [vmem:[%s2784_s26 + $0xc0] sm:$0xff] }
 0x152   : > { %2551 = vmatmul.msk.bf16.gmra.mxu3 %vm666_vm4, %v3529_v30  ;;  %v1538_v63 = vsel %vm2811_vm3, %v1533_v38, %v1537_v60 }
 0x153   : > { %v3552_v46 = vpack.c.b16 %v1192_v34, %v1191_v18  ;;  %v1542_v39 = vunpack.c.l.b16 %v1538_v63 }
 0x154   : > { %v1589_v48 = vpop.f32.mrf.mxu0 }
 0x155   : > { %v1433_v28 = vpop.f32.mrf.mxu3  ;;  %v983_v51 = vpop.f32.mrf.mxu1 }
 0x156   : > { %v1495_v5 = vadd.f32 %v1433_v28, %v1361_v17  ;;  %v1528_v17 = vsel %vm2811_vm3, %v1523_v58, %v1527_v22 }
 0x157   : > { %2568 = vmatmul.msk.bf16.gmra.mxu0 %vm666_vm4, %v3123_v53  ;;  %v1541_v2 = vunpack.c.l.b16 %v1528_v17 }
 0x158   : > { %v1301_v61 = vpop.f32.mrf.mxu2  ;;  %2498 = vmatmul.msk.bf16.gmra.mxu1 %vm666_vm4, %v3529_v30  ;;  %v3550_v7 = vadd.f32 %v1589_v48, %v1495_v5  ;;  %v984_v48 = vadd.f32 %v983_v51, %v3312_v26 }
 0x159   : > { %v1362_v9 = vadd.f32 %v1301_v61, %v981_v24  ;;  %v3568_v22 = vpack.c.b16 %v1542_v39, %v1541_v2 }
 0x15c   : > { %v1591_v43 = vpop.f32.mrf.mxu0 }
 0x15d   : > { %v1435_v15 = vpop.f32.mrf.mxu3  ;;  %2531 = vmatmul.msk.bf16.gmra.mxu2 %vm666_vm4, %v3552_v46  ;;  %v985_v47 = vpop.f32.mrf.mxu1 }
 0x15e   : > { %v1496_v31 = vadd.f32 %v1435_v15, %v1362_v9  ;;  %v986_v26 = vadd.f32 %v985_v47, %v3329_v0 }
 0x160   : > { %v1304_v29 = vpop.f32.mrf.mxu2  ;;  %v3564_v28 = vadd.f32 %v1591_v43, %v1496_v31 }
 0x161   : > { %v1363_v18 = vadd.f32 %v1304_v29, %v984_v48 }
 0x162   : > { %2552 = vmatmul.msk.bf16.gmra.mxu3 %vm666_vm4, %v3561_v54 }
 0x164   : > { %v1594_v34 = vpop.f32.mrf.mxu0 }
 0x165   : > { %v1438_v5 = vpop.f32.mrf.mxu3  ;;  %v988_v24 = vpop.f32.mrf.mxu1 }
 0x166   : > { %v1497_v61 = vadd.f32 %v1438_v5, %v1363_v18  ;;  %v989_v63 = vadd.f32 %v988_v24, %v3214_v16 }
 0x167   : > { %2569 = vmatmul.msk.bf16.gmra.mxu0 %vm666_vm4, %v3568_v22 }
 0x168   : > { %v1306_v51 = vpop.f32.mrf.mxu2  ;;  %2572 = vmatmul.msk.bf16.vlgmr.msra.gmra.mxu1 %vm666_vm4, %v3148_v55  ;;  %v3575_v58 = vadd.f32 %v1594_v34, %v1497_v61 }
 0x169   : > { %v1364_v38 = vadd.f32 %v1306_v51, %v986_v26 }
 0x16c   : > { %v1596_v60 = vpop.f32.mrf.mxu0 }
 0x16d   : > { %v1440_v9 = vpop.f32.mrf.mxu3  ;;  %2593 = vmatmul.msk.bf16.vlgmr.msra.gmra.mxu2 %vm666_vm4, %v3160_v6  ;;  %v990_v43 = vpop.f32.mrf.mxu1 }
 0x16e   : > { %v1498_v17 = vadd.f32 %v1440_v9, %v1364_v38  ;;  %v991_v6 = vadd.f32 %v990_v43, %v3236_v57 }
 0x170   : > { %v1309_v15 = vpop.f32.mrf.mxu2  ;;  %v3580_v31 = vadd.f32 %v1596_v60, %v1498_v17 }
 0x171   : > { %v1365_v0 = vadd.f32 %v1309_v15, %v989_v63 }
 0x172   : > { %2610 = vmatmul.msk.bf16.vlgmr.msra.gmra.mxu3 %vm666_vm4, %v3051_v45 }
 0x174   : > { %v1599_v55 = vpop.f32.mrf.mxu0 }
 0x175   : > { %v1443_v47 = vpop.f32.mrf.mxu3  ;;  %v993_v48 = vpop.f32.mrf.mxu1 }
 0x176   : > { %v1499_v2 = vadd.f32 %v1443_v47, %v1365_v0  ;;  %v994_v24 = vadd.f32 %v993_v48, %v3256_v59 }
 0x177   : > { %2628 = vmatmul.msk.bf16.vlgmr.msra.gmra.mxu0 %vm666_vm4, %v3174_v52 }
 0x178   : > { %v1311_v39 = vpop.f32.mrf.mxu2  ;;  %2573 = vmatmul.msk.bf16.gmra.mxu1 %vm666_vm4, %v3174_v52  ;;  %v3589_v16 = vadd.f32 %v1599_v55, %v1499_v2 }
 0x179   : > { %v1366_v29 = vadd.f32 %v1311_v39, %v991_v6 }
 0x17c   : > { %v1601_v18 = vpop.f32.mrf.mxu0 }
 0x17d   : > { %v1445_v34 = vpop.f32.mrf.mxu3  ;;  %2594 = vmatmul.msk.bf16.gmra.mxu2 %vm666_vm4, %v3180_v41  ;;  %v995_v45 = vpop.f32.mrf.mxu1 }
 0x17e   : > { %v1500_v5 = vadd.f32 %v1445_v34, %v1366_v29  ;;  %v996_v41 = vadd.f32 %v995_v45, %v3274_v3 }
 0x180   : > { %v1314_v61 = vpop.f32.mrf.mxu2  ;;  %v3594_v26 = vadd.f32 %v1601_v18, %v1500_v5 }
 0x181   : > { %v1367_v57 = vadd.f32 %v1314_v61, %v994_v24 }
 0x182   : > { %2611 = vmatmul.msk.bf16.gmra.mxu3 %vm666_vm4, %v3141_v20 }
 0x184   : > { %v1604_v52 = vpop.f32.mrf.mxu0 }
 0x185   : > { %v1448_v51 = vpop.f32.mrf.mxu3  ;;  %v998_v38 = vpop.f32.mrf.mxu1 }
 0x186   : > { %v1501_v60 = vadd.f32 %v1448_v51, %v1367_v57  ;;  %v999_v0 = vadd.f32 %v998_v38, %v3293_v23 }
 0x187   : > { %2629 = vmatmul.msk.bf16.gmra.mxu0 %vm666_vm4, %v3194_v40 }
 0x188   : > { %v1316_v9 = vpop.f32.mrf.mxu2  ;;  %2574 = vmatmul.msk.bf16.gmra.mxu1 %vm666_vm4, %v3194_v40  ;;  %v3603_v59 = vadd.f32 %v1604_v52, %v1501_v60 }
 0x189   : > { %v1368_v43 = vadd.f32 %v1316_v9, %v996_v41 }
 0x18c   : > { %v1606_v17 = vpop.f32.mrf.mxu0 }
 0x18d   : > { %v1450_v63 = vpop.f32.mrf.mxu3  ;;  %2595 = vmatmul.msk.bf16.gmra.mxu2 %vm666_vm4, %v3202_v8  ;;  %v1000_v20 = vpop.f32.mrf.mxu1 }
 0x18e   : > { %v1502_v15 = vadd.f32 %v1450_v63, %v1368_v43  ;;  %v1001_v8 = vadd.f32 %v1000_v20, %v3314_v1  ;;  %v3959_v43 = vld [vmem:[#allocation18_spill] sm:$0xff]  ;;  %v3960_v63 = vld [vmem:[#allocation16_spill] sm:$0xff] }
 0x190   : > { %v1319_v55 = vpop.f32.mrf.mxu2  ;;  %v3608_v47 = vadd.f32 %v1606_v17, %v1502_v15 }
 0x191   : > { %v1369_v3 = vadd.f32 %v1319_v55, %v999_v0  ;;  %v3961_v55 = vld [vmem:[#allocation8_spill] sm:$0xff] }
 0x192   : > { %2612 = vmatmul.msk.bf16.gmra.mxu3 %vm666_vm4, %v2823_v62 }
 0x194   : > { %v1609_v40 = vpop.f32.mrf.mxu0 }
 0x195   : > { %v1453_v48 = vpop.f32.mrf.mxu3  ;;  %v1003_v2 = vpop.f32.mrf.mxu1 }
 0x196   : > { %v1503_v6 = vadd.f32 %v1453_v48, %v1369_v3  ;;  %v1004_v5 = vadd.f32 %v1003_v2, %v3336_v56  ;;  %v3962_v2 = vld [vmem:[#allocation21_spill] sm:$0xff] }
 0x197   : > { %2630 = vmatmul.msk.bf16.gmra.mxu0 %vm666_vm4, %v3222_v12 }
 0x198   : > { %v1321_v39 = vpop.f32.mrf.mxu2  ;;  %2575 = vmatmul.msk.bf16.gmra.mxu1 %vm666_vm4, %v3222_v12  ;;  %v3617_v23 = vadd.f32 %v1609_v40, %v1503_v6  ;;  %v3963_v6 = vld [vmem:[#allocation17_spill] sm:$0xff] }
 0x199   : > { %v1370_v29 = vadd.f32 %v1321_v39, %v1001_v8 }
 0x19c   : > { %v1611_v18 = vpop.f32.mrf.mxu0 }
 0x19d   : > { %v1455_v34 = vpop.f32.mrf.mxu3  ;;  %2596 = vmatmul.msk.bf16.gmra.mxu2 %vm666_vm4, %v3230_v27  ;;  %v1005_v62 = vpop.f32.mrf.mxu1 }
 0x19e   : > { %v1504_v45 = vadd.f32 %v1455_v34, %v1370_v29  ;;  %v1006_v27 = vadd.f32 %v1005_v62, %v3351_v44 }
 0x1a0   : > { %v1324_v24 = vpop.f32.mrf.mxu2  ;;  %v3622_v61 = vadd.f32 %v1611_v18, %v1504_v45  ;;  %v3964_v45 = vld [vmem:[#allocation22_spill] sm:$0xff] }
 0x1a1   : > { %v1371_v1 = vadd.f32 %v1324_v24, %v1004_v5 }
 0x1a2   : > { %2613 = vmatmul.msk.bf16.gmra.mxu3 %vm666_vm4, %v2897_v37 }
 0x1a4   : > { %v1614_v12 = vpop.f32.mrf.mxu0 }
 0x1a5   : > { %v1458_v57 = vpop.f32.mrf.mxu3  ;;  %v1008_v52 = vpop.f32.mrf.mxu1 }
 0x1a6   : > { %v1505_v51 = vadd.f32 %v1458_v57, %v1371_v1  ;;  %v1009_v20 = vadd.f32 %v1008_v52, %v3960_v63  ;;  %v3965_v1 = vld [vmem:[#allocation19_spill] sm:$0xff] }
 0x1a7   : > { %2631 = vmatmul.msk.bf16.gmra.mxu0 %vm666_vm4, %v3254_v33 }
 0x1a8   : > { %v1326_v38 = vpop.f32.mrf.mxu2  ;;  %2576 = vmatmul.msk.bf16.gmra.mxu1 %vm666_vm4, %v3254_v33  ;;  %v3631_v56 = vadd.f32 %v1614_v12, %v1505_v51 }
 0x1a9   : > { %v1372_v60 = vadd.f32 %v1326_v38, %v1006_v27  ;;  %v3966_v27 = vld [vmem:[#allocation14_spill] sm:$0xff] }
 0x1ac   : > { %v1616_v41 = vpop.f32.mrf.mxu0 }
 0x1ad   : > { %v1460_v9 = vpop.f32.mrf.mxu3  ;;  %2597 = vmatmul.msk.bf16.gmra.mxu2 %vm666_vm4, %v3959_v43  ;;  %v1010_v37 = vpop.f32.mrf.mxu1  ;;  %v3967_v43 = vld [vmem:[#allocation24_spill] sm:$0xff] }
 0x1ae   : > { %v1506_v17 = vadd.f32 %v1460_v9, %v1372_v60  ;;  %v1011_v8 = vadd.f32 %v1010_v37, %v3963_v6  ;;  %v3968_v37 = vld [vmem:[#allocation20_spill] sm:$0xff] }
 0x1b0   : > { %v1329_v15 = vpop.f32.mrf.mxu2  ;;  %v3636_v0 = vadd.f32 %v1616_v41, %v1506_v17 }
 0x1b1   : > { %v1373_v44 = vadd.f32 %v1329_v15, %v1009_v20 }
 0x1b2   : > { %2614 = vmatmul.msk.bf16.gmra.mxu3 %vm666_vm4, %v3961_v55 }
 0x1b4   : > { %v1619_v33 = vpop.f32.mrf.mxu0 }
 0x1b5   : > { %v1463_v3 = vpop.f32.mrf.mxu3  ;;  %v1013_v40 = vpop.f32.mrf.mxu1 }
 0x1b6   : > { %v1507_v48 = vadd.f32 %v1463_v3, %v1373_v44  ;;  %v1014_v12 = vadd.f32 %v1013_v40, %v3965_v1  ;;  %v3973_v1 = vld [vmem:[#allocation25_spill] sm:$0xff] }
 0x1b7   : > { %2632 = vmatmul.msk.bf16.gmra.mxu0 %vm666_vm4, %v3962_v2 }
 0x1b8   : > { %v1331_v39 = vpop.f32.mrf.mxu2  ;;  %2577 = vmatmul.msk.bf16.gmra.mxu1 %vm666_vm4, %v3962_v2  ;;  %v3645_v29 = vadd.f32 %v1619_v33, %v1507_v48  ;;  %v3969_v33 = vld [vmem:[#allocation26_spill] sm:$0xff]  ;;  %v3970_v48 = vld [vmem:[#allocation23_spill] sm:$0xff] }
 0x1b9   : > { %v1374_v18 = vadd.f32 %v1331_v39, %v1011_v8 }
 0x1bc   : > { %v1621_v34 = vpop.f32.mrf.mxu0 }
 0x1bd   : > { %v1465_v62 = vpop.f32.mrf.mxu3  ;;  %2598 = vmatmul.msk.bf16.gmra.mxu2 %vm666_vm4, %v3964_v45  ;;  %v1015_v5 = vpop.f32.mrf.mxu1 }
 0x1be   : > { %v1508_v24 = vadd.f32 %v1465_v62, %v1374_v18  ;;  %v1016_v17 = vadd.f32 %v1015_v5, %v3968_v37  ;;  %v3971_v18 = vld [vmem:[#allocation2_spill] sm:$0xff] }
 0x1c0   : > { %v1334_v57 = vpop.f32.mrf.mxu2  ;;  %v3650_v52 = vadd.f32 %v1621_v34, %v1508_v24  ;;  %v3972_v24 = vld [vmem:[#allocation28_spill] sm:$0xff] }
 0x1c1   : > { %v1375_v51 = vadd.f32 %v1334_v57, %v1014_v12 }
 0x1c2   : > { %2615 = vmatmul.msk.bf16.gmra.mxu3 %vm666_vm4, %v3966_v27 }
 0x1c4   : > { %v1624_v38 = vpop.f32.mrf.mxu0 }
 0x1c5   : > { %v1468_v60 = vpop.f32.mrf.mxu3  ;;  %v1018_v41 = vpop.f32.mrf.mxu1 }
 0x1c6   : > { %v1509_v9 = vadd.f32 %v1468_v60, %v1375_v51  ;;  %v1019_v2 = vadd.f32 %v1018_v41, %v3970_v48 }
 0x1c7   : > { %2633 = vmatmul.msk.bf16.gmra.mxu0 %vm666_vm4, %v3967_v43 }
 0x1c8   : > { %v1336_v63 = vpop.f32.mrf.mxu2  ;;  %2578 = vmatmul.msk.bf16.gmra.mxu1 %vm666_vm4, %v3967_v43  ;;  %v3659_v20 = vadd.f32 %v1624_v38, %v1509_v9  ;;  %v3974_v43 = vld [vmem:[#allocation27_spill] sm:$0xff] }
 0x1c9   : > { %v1376_v15 = vadd.f32 %v1336_v63, %v1016_v17 }
 0x1cc   : > { %v1626_v44 = vpop.f32.mrf.mxu0 }
 0x1cd   : > { %v1470_v55 = vpop.f32.mrf.mxu3  ;;  %2599 = vmatmul.msk.bf16.gmra.mxu2 %vm666_vm4, %v3969_v33  ;;  %v1020_v3 = vpop.f32.mrf.mxu1 }
 0x1ce   : > { %v1510_v40 = vadd.f32 %v1470_v55, %v1376_v15  ;;  %v1021_v12 = vadd.f32 %v1020_v3, %v3973_v1 }
 0x1d0   : > { %v1339_v6 = vpop.f32.mrf.mxu2  ;;  %v3664_v8 = vadd.f32 %v1626_v44, %v1510_v40  ;;  %v3975_v40 = vld [vmem:[#allocation29_spill] sm:$0xff] }
 0x1d1   : > { %v1377_v39 = vadd.f32 %v1339_v6, %v1019_v2 }
 0x1d2   : > { %2616 = vmatmul.msk.bf16.gmra.mxu3 %vm666_vm4, %v3971_v18 }
 0x1d4   : > { %v1629_v34 = vpop.f32.mrf.mxu0 }
 0x1d5   : > { %v1473_v62 = vpop.f32.mrf.mxu3  ;;  %v1023_v45 = vpop.f32.mrf.mxu1 }
 0x1d6   : > { %v1511_v5 = vadd.f32 %v1473_v62, %v1377_v39  ;;  %v1024_v37 = vadd.f32 %v1023_v45, %v3974_v43 }
 0x1d7   : > { %2634 = vmatmul.msk.bf16.gmra.mxu0 %vm666_vm4, %v3972_v24 }
 0x1d8   : > { %v1341_v57 = vpop.f32.mrf.mxu2  ;;  %2579 = vmatmul.msk.bf16.gmra.mxu1 %vm666_vm4, %v3972_v24  ;;  %v3673_v51 = vadd.f32 %v1629_v34, %v1511_v5 }
 0x1d9   : > { %v1378_v27 = vadd.f32 %v1341_v57, %v1021_v12 }
 0x1dc   : > { %v1631_v38 = vpop.f32.mrf.mxu0 }
 0x1dd   : > { %v1475_v60 = vpop.f32.mrf.mxu3  ;;  %2600 = vmatmul.msk.bf16.gmra.mxu2 %vm666_vm4, %v3366_v19  ;;  %v1025_v41 = vpop.f32.mrf.mxu1 }
 0x1de   : > { %v1512_v9 = vadd.f32 %v1475_v60, %v1378_v27  ;;  %v1026_v19 = vadd.f32 %v1025_v41, %v3975_v40 }
 0x1e0   : > { %v1344_v17 = vpop.f32.mrf.mxu2  ;;  %v3678_v63 = vadd.f32 %v1631_v38, %v1512_v9 }
 0x1e1   : > { %v1379_v15 = vadd.f32 %v1344_v17, %v1024_v37 }
 0x1e2   : > { %2617 = vmatmul.msk.bf16.gmra.mxu3 %vm666_vm4, %v2922_v4 }
 0x1e4   : > { %v1634_v44 = vpop.f32.mrf.mxu0 }
 0x1e5   : > { %v1478_v55 = vpop.f32.mrf.mxu3  ;;  %v1699_v33 = vpop.f32.mrf.mxu1 }
 0x1e6   : > { %v1513_v3 = vadd.f32 %v1478_v55, %v1379_v15  ;;  %v1779_v62 = vadd.f32 %v1699_v33, %v3381_v32  ;;  %v3976_v15 = vld [vmem:[#allocation15_spill] sm:$0xff] }
 0x1e7   : > { %2635 = vmatmul.msk.bf16.gmra.mxu0 %vm666_vm4, %v3383_v10 }
 0x1e8   : > { %v1346_v48 = vpop.f32.mrf.mxu2  ;;  %2580 = vmatmul.msk.bf16.gmra.mxu1 %vm666_vm4, %v3383_v10  ;;  %v3687_v2 = vadd.f32 %v1634_v44, %v1513_v3 }
 0x1e9   : > { %v1380_v6 = vadd.f32 %v1346_v48, %v1026_v19  ;;  %v3977_v19 = vld [vmem:[#allocation31_spill] sm:$0xff]  ;;  %v3978_v48 = vld [vmem:[#allocation9_spill] sm:$0xff] }
 0x1ec   : > { %v1636_v39 = vpop.f32.mrf.mxu0 }
 0x1ed   : > { %v1480_v18 = vpop.f32.mrf.mxu3  ;;  %2601 = vmatmul.msk.bf16.gmra.mxu2 %vm666_vm4, %v3390_v42  ;;  %v1701_v4 = vpop.f32.mrf.mxu1 }
 0x1ee   : > { %v1514_v34 = vadd.f32 %v1480_v18, %v1380_v6  ;;  %v1780_v27 = vadd.f32 %v1701_v4, %v3394_v35 }
 0x1f0   : > { %v1833_v45 = vpop.f32.mrf.mxu2  ;;  %v3692_v5 = vadd.f32 %v1636_v39, %v1514_v34 }
 0x1f1   : > { %v1913_v10 = vadd.f32 %v1833_v45, %v1779_v62  ;;  %v3979_v62 = vld [vmem:[#allocation32_spill] sm:$0xff] }
 0x1f2   : > { %2618 = vmatmul.msk.bf16.gmra.mxu3 %vm666_vm4, %v3007_v25 }
 0x1f4   : > { %v2129_v24 = vpop.f32.mrf.mxu0 }
 0x1f5   : > { %v1989_v1 = vpop.f32.mrf.mxu3  ;;  %v1704_v12 = vpop.f32.mrf.mxu1 }
 0x1f6   : > { %v2069_v57 = vadd.f32 %v1989_v1, %v1913_v10  ;;  %v3980_v1 = vld [vmem:[#allocation30_spill] sm:$0xff] }
 0x1f7   : > { %2636 = vmatmul.msk.bf16.gmra.mxu0 %vm666_vm4, %v3409_v13 }
 0x1f8   : > { %v2209_v42 = vadd.f32 %v2129_v24, %v2069_v57  ;;  %v1835_v38 = vpop.f32.mrf.mxu2  ;;  %2581 = vmatmul.msk.bf16.gmra.mxu1 %vm666_vm4, %v3409_v13  ;;  %v1781_v13 = vadd.f32 %v1704_v12, %v3407_v21 }
 0x1f9   : > { %v1914_v32 = vadd.f32 %v1835_v38, %v1780_v27  ;;  %v3981_v27 = vld [vmem:[#allocation3_spill] sm:$0xff] }
 0x1fa   : > { %v2241_v25 = vmax.f32 %v2209_v42, 0.0 }
 0x1fc   : > { %2273 = vst [vmem:[%s3705_s14] sm:$0xff] %v2241_v25  ;;  %v2131_v60 = vpop.f32.mrf.mxu0 }
 0x1fd   : > { %v1991_v41 = vpop.f32.mrf.mxu3  ;;  %2602 = vmatmul.msk.bf16.gmra.mxu2 %vm666_vm4, %v3416_v50  ;;  %v1706_v35 = vpop.f32.mrf.mxu1 }
 0x1fe   : > { %v2070_v9 = vadd.f32 %v1991_v41, %v1914_v32  ;;  %v1782_v6 = vadd.f32 %v1706_v35, %v3978_v48  ;;  %v3982_v35 = vld [vmem:[#allocation35_spill] sm:$0xff] }
 0x200   : > { %v2210_v43 = vadd.f32 %v2131_v60, %v2070_v9  ;;  %v1838_v37 = vpop.f32.mrf.mxu2 }
 0x201   : > { %v1915_v44 = vadd.f32 %v1838_v37, %v1781_v13 }
 0x202   : > { %v2242_v17 = vmax.f32 %v2210_v43, 0.0  ;;  %2619 = vmatmul.msk.bf16.gmra.mxu3 %vm666_vm4, %v3976_v15  ;;  %v3983_v43 = vld [vmem:[#allocation33_spill] sm:$0xff] }
 0x204   : > { %2274 = vst [vmem:[%s3705_s14 + $0x8] sm:$0xff] %v2242_v17  ;;  %v2134_v55 = vpop.f32.mrf.mxu0 }
 0x205   : > { %v1994_v33 = vpop.f32.mrf.mxu3  ;;  %v1709_v3 = vpop.f32.mrf.mxu1 }
 0x206   : > { %v2071_v40 = vadd.f32 %v1994_v33, %v1915_v44  ;;  %v1783_v12 = vadd.f32 %v1709_v3, %v3980_v1  ;;  %v3984_v33 = vld [vmem:[#allocation36_spill] sm:$0xff]  ;;  %v3988_v1 = vld [vmem:[#allocation37_spill] sm:$0xff] }
 0x207   : > { %2637 = vmatmul.msk.bf16.gmra.mxu0 %vm666_vm4, %v3977_v19 }
 0x208   : > { %v2211_v50 = vadd.f32 %v2134_v55, %v2071_v40  ;;  %v1840_v39 = vpop.f32.mrf.mxu2  ;;  %2582 = vmatmul.msk.bf16.gmra.mxu1 %vm666_vm4, %v3977_v19 }
 0x209   : > { %v1916_v18 = vadd.f32 %v1840_v39, %v1782_v6 }
 0x20a   : > { %v2243_v21 = vmax.f32 %v2211_v50, 0.0  ;;  %v3985_v50 = vld [vmem:[#allocation34_spill] sm:$0xff] }
 0x20c   : > { %2275 = vst [vmem:[%s3705_s14 + $0x10] sm:$0xff] %v2243_v21  ;;  %v2136_v4 = vpop.f32.mrf.mxu0  ;;  %v3986_v21 = vld [vmem:[#allocation4_spill] sm:$0xff] }
 0x20d   : > { %v1996_v34 = vpop.f32.mrf.mxu3  ;;  %2603 = vmatmul.msk.bf16.gmra.mxu2 %vm666_vm4, %v3979_v62  ;;  %v1711_v45 = vpop.f32.mrf.mxu1 }
 0x20e   : > { %v2072_v10 = vadd.f32 %v1996_v34, %v1916_v18  ;;  %v1784_v13 = vadd.f32 %v1711_v45, %v3983_v43 }
 0x210   : > { %v2212_v24 = vadd.f32 %v2136_v4, %v2072_v10  ;;  %v1843_v57 = vpop.f32.mrf.mxu2  ;;  %v3987_v10 = vld [vmem:[#allocation39_spill] sm:$0xff] }
 0x211   : > { %v1917_v38 = vadd.f32 %v1843_v57, %v1783_v12 }
 0x212   : > { %v2244_v42 = vmax.f32 %v2212_v24, 0.0  ;;  %2620 = vmatmul.msk.bf16.gmra.mxu3 %vm666_vm4, %v3981_v27 }
 0x214   : > { %2276 = vst [vmem:[%s3705_s14 + $0x18] sm:$0xff] %v2244_v42  ;;  %v2139_v25 = vpop.f32.mrf.mxu0 }
 0x215   : > { %v1999_v32 = vpop.f32.mrf.mxu3  ;;  %v1714_v60 = vpop.f32.mrf.mxu1 }
 0x216   : > { %v2073_v41 = vadd.f32 %v1999_v32, %v1917_v38  ;;  %v1785_v48 = vadd.f32 %v1714_v60, %v3985_v50  ;;  %v3989_v32 = vld [vmem:[#allocation6_spill] sm:$0xff]  ;;  %v3993_v50 = vld [vmem:[#allocation7_spill] sm:$0xff] }
 0x217   : > { %2638 = vmatmul.msk.bf16.gmra.mxu0 %vm666_vm4, %v3982_v35 }
 0x218   : > { %v2213_v9 = vadd.f32 %v2139_v25, %v2073_v41  ;;  %v1845_v37 = vpop.f32.mrf.mxu2  ;;  %2583 = vmatmul.msk.bf16.gmra.mxu1 %vm666_vm4, %v3982_v35 }
 0x219   : > { %v1918_v15 = vadd.f32 %v1845_v37, %v1784_v13 }
 0x21a   : > { %v2245_v17 = vmax.f32 %v2213_v9, 0.0  ;;  %v3990_v9 = vld [vmem:[#allocation38_spill] sm:$0xff] }
 0x21c   : > { %2277 = vst [vmem:[%s3705_s14 + $0x20] sm:$0xff] %v2245_v17  ;;  %v2141_v44 = vpop.f32.mrf.mxu0  ;;  %v3991_v17 = vld [vmem:[#allocation10_spill] sm:$0xff] }
 0x21d   : > { %v2001_v55 = vpop.f32.mrf.mxu3  ;;  %2604 = vmatmul.msk.bf16.gmra.mxu2 %vm666_vm4, %v3984_v33  ;;  %v1716_v3 = vpop.f32.mrf.mxu1 }
 0x21e   : > { %v2074_v40 = vadd.f32 %v2001_v55, %v1918_v15  ;;  %v1786_v12 = vadd.f32 %v1716_v3, %v3988_v1 }
 0x220   : > { %v2214_v19 = vadd.f32 %v2141_v44, %v2074_v40  ;;  %v1848_v6 = vpop.f32.mrf.mxu2  ;;  %v3992_v40 = vld [vmem:[#allocation41_spill] sm:$0xff] }
 0x221   : > { %v1919_v18 = vadd.f32 %v1848_v6, %v1785_v48 }
 0x222   : > { %v2246_v39 = vmax.f32 %v2214_v19, 0.0  ;;  %2621 = vmatmul.msk.bf16.gmra.mxu3 %vm666_vm4, %v3986_v21 }
 0x224   : > { %2278 = vst [vmem:[%s3705_s14 + $0x28] sm:$0xff] %v2246_v39  ;;  %v2144_v4 = vpop.f32.mrf.mxu0 }
 0x225   : > { %v2004_v34 = vpop.f32.mrf.mxu3  ;;  %v1719_v62 = vpop.f32.mrf.mxu1 }
 0x226   : > { %v2075_v45 = vadd.f32 %v2004_v34, %v1919_v18  ;;  %v1787_v43 = vadd.f32 %v1719_v62, %v3990_v9 }
 0x227   : > { %2639 = vmatmul.msk.bf16.gmra.mxu0 %vm666_vm4, %v3987_v10 }
 0x228   : > { %v2215_v24 = vadd.f32 %v2144_v4, %v2075_v45  ;;  %v1850_v57 = vpop.f32.mrf.mxu2  ;;  %2584 = vmatmul.msk.bf16.gmra.mxu1 %vm666_vm4, %v3987_v10  ;;  %v3994_v10 = vld [vmem:[#allocation40_spill] sm:$0xff] }
 0x229   : > { %v1920_v27 = vadd.f32 %v1850_v57, %v1786_v12 }
 0x22a   : > { %v2247_v42 = vmax.f32 %v2215_v24, 0.0 }
 0x22c   : > { %2279 = vst [vmem:[%s3705_s14 + $0x30] sm:$0xff] %v2247_v42  ;;  %v2146_v38 = vpop.f32.mrf.mxu0 }
 0x22d   : > { %v2006_v25 = vpop.f32.mrf.mxu3  ;;  %2605 = vmatmul.msk.bf16.gmra.mxu2 %vm666_vm4, %v3989_v32  ;;  %v1721_v60 = vpop.f32.mrf.mxu1  ;;  %v3767_v32 = vld [vmem:[%s2784_s26 + $0xd0] sm:$0xf] }
 0x22e   : > { %v2076_v41 = vadd.f32 %v2006_v25, %v1920_v27  ;;  %v1788_v48 = vadd.f32 %v1721_v60, %v3993_v50  ;;  %v3995_v27 = vld [vmem:[#allocation42_spill] sm:$0xff]  ;;  %v3764_v25 = vld [vmem:[%s2784_s26 + $0xcc] sm:$0xf] }
 0x230   : > { %v2216_v35 = vadd.f32 %v2146_v38, %v2076_v41  ;;  %v1853_v13 = vpop.f32.mrf.mxu2  ;;  %v1674_v38 = vrot.slane %v3995_v27, 5 }
 0x231   : > { %v1921_v15 = vadd.f32 %v1853_v13, %v1787_v43  ;;  %v1946_v43 = vshrl.u32 %v3764_v25, 16  ;;  %v1955_v13 = vshll.u32 %v3767_v32, 16 }
 0x232   : > { %v2248_v37 = vmax.f32 %v2216_v35, 0.0  ;;  %2622 = vmatmul.msk.bf16.gmra.mxu3 %vm666_vm4, %v3991_v17  ;;  %v3996_v35 = vld [vmem:[#allocation5_spill] sm:$0xff] }
 0x233   : > { %v2570_v9 = vrot.slane %v3996_v35, 9  ;;  %v1948_v50 = vrot.slane %v1946_v43, 4 }
 0x234   : > { %2280 = vst [vmem:[%s3705_s14 + $0x38] sm:$0xff] %v2248_v37  ;;  %v2149_v44 = vpop.f32.mrf.mxu0  ;;  %v1959_v37 = vshrl.u32 %v3767_v32, 16 }
 0x235   : > { %v2009_v55 = vpop.f32.mrf.mxu3  ;;  %v1724_v33 = vpop.f32.mrf.mxu1 }
 0x236   : > { %v2077_v3 = vadd.f32 %v2009_v55, %v1921_v15  ;;  %v1789_v24 = vadd.f32 %v1724_v33, %v3994_v10  ;;  %v1676_v55 = vrot.slane %v1674_v38, 4  ;;  %v1677_v33 = vrot.slane %v3536_v11, 5 }
 0x237   : > { %2640 = vmatmul.msk.bf16.gmra.mxu0 %vm666_vm4, %v3992_v40 }
 0x238   : > { %v2217_v19 = vadd.f32 %v2149_v44, %v2077_v3  ;;  %v1855_v6 = vpop.f32.mrf.mxu2  ;;  %2585 = vmatmul.msk.bf16.gmra.mxu1 %vm666_vm4, %v3992_v40 }
 0x239   : > { %v1922_v21 = vadd.f32 %v1855_v6, %v1788_v48  ;;  %v1957_v6 = vrot.slane %v1955_v13, 5 }
 0x23a   : > { %v2249_v39 = vmax.f32 %v2217_v19, 0.0  ;;  %v1675_v19 = vsel %vm3114_vm7, %v2570_v9, %v1674_v38  ;;  %v2104_v9 = vrot.slane %v3767_v32, 5 }
 0x23c   : > { %2281 = vst [vmem:[%s3705_s14 + $0x40] sm:$0xff] %v2249_v39  ;;  %v2151_v18 = vpop.f32.mrf.mxu0  ;;  %v1961_v39 = vrot.slane %v1959_v37, 4  ;;  %v2106_v32 = vrot.slane %v2104_v9, 4 }
 0x23d   : > { %v2011_v4 = vpop.f32.mrf.mxu3  ;;  %2606 = vmatmul.msk.bf16.gmra.mxu2 %vm666_vm4, %v3529_v30  ;;  %v1726_v34 = vpop.f32.mrf.mxu1 }
 0x23e   : > { %v2078_v62 = vadd.f32 %v2011_v4, %v1922_v21  ;;  %v1790_v15 = vadd.f32 %v1726_v34, %v3533_v49  ;;  %v1678_v49 = vsel %vm3114_vm7, %v1676_v55, %v1677_v33  ;;  %v1681_v34 = vunpack.c.l.b16 %v1675_v19  ;;  %v2664_v55 = vld [vmem:[%s2784_s26 + $0xcc] sm:$0xff] }
 0x23f   : > { %v1962_v10 = vor.u32 %v1961_v39, %v1957_v6 }
 0x240   : > { %v2218_v45 = vadd.f32 %v2151_v18, %v2078_v62  ;;  %v1858_v1 = vpop.f32.mrf.mxu2  ;;  %v227_v18 = vld [vmem:[%s2784_s26 + $0xd4] sm:$0x1]  ;;  %v1682_v62 = vunpack.c.l.b16 %v1678_v49 }
 0x241   : > { %v1923_v57 = vadd.f32 %v1858_v1, %v1789_v24  ;;  %v1965_v24 = vshll.u32 %v227_v18, 16 }
 0x242   : > { %v2250_v12 = vmax.f32 %v2218_v45, 0.0  ;;  %2623 = vmatmul.msk.bf16.gmra.mxu3 %vm666_vm4, %v3123_v53  ;;  %v1949_v53 = vshll.u32 %v3764_v25, 16  ;;  %v1683_v38 = vpack.c.b16 %v1682_v62, %v1681_v34 }
 0x244   : > { %2282 = vst [vmem:[%s3705_s14 + $0x48] sm:$0xff] %v2250_v12  ;;  %v2154_v42 = vpop.f32.mrf.mxu0  ;;  %v1951_v48 = vrot.slane %v1949_v53, 5 }
 0x245   : > { %v2014_v30 = vpop.f32.mrf.mxu3  ;;  %v1729_v60 = vpop.f32.mrf.mxu1 }
 0x246   : > { %v2079_v41 = vadd.f32 %v2014_v30, %v1923_v57  ;;  %v1952_v45 = vor.u32 %v1951_v48, %v1948_v50  ;;  %v1791_v12 = vadd.f32 %v1729_v60, %v3550_v7  ;;  %v2626_v60 = vrot.slane %v3764_v25, 9 }
 0x247   : > { %2641 = vmatmul.msk.bf16.gmra.mxu0 %vm666_vm4, %v3552_v46 }
 0x248   : > { %v2219_v17 = vadd.f32 %v2154_v42, %v2079_v41  ;;  %v1860_v44 = vpop.f32.mrf.mxu2  ;;  %2586 = vmatmul.msk.bf16.gmra.mxu1 %vm666_vm4, %v3552_v46  ;;  %v1953_v30 = vrot.slane %v1952_v45, 4  ;;  %v1967_v41 = vrot.slane %v1965_v24, 5  ;;  %v2105_v36 = vsel %vm3114_vm7, %v2626_v60, %v2104_v9 }
 0x249   : > { %v1924_v40 = vadd.f32 %v1860_v44, %v1790_v15  ;;  %v2107_v44 = vrot.slane %v227_v18, 5 }
 0x24a   : > { %v2251_v3 = vmax.f32 %v2219_v17, 0.0  ;;  %v1958_v7 = vsel %vm2811_vm3, %v1953_v30, %v1957_v6 }
 0x24b   : > { %v2108_v25 = vsel %vm3114_vm7, %v2106_v32, %v2107_v44 }
 0x24c   : > { %2283 = vst [vmem:[%s3705_s14 + $0x50] sm:$0xff] %v2251_v3  ;;  %v2156_v21 = vpop.f32.mrf.mxu0  ;;  %v2112_v49 = vunpack.c.l.b16 %v2108_v25 }
 0x24d   : > { %v2016_v4 = vpop.f32.mrf.mxu3  ;;  %2607 = vmatmul.msk.bf16.gmra.mxu2 %vm666_vm4, %v3561_v54  ;;  %v1731_v11 = vpop.f32.mrf.mxu1  ;;  %v1963_v54 = vrot.slane %v1962_v10, 4 }
 0x24e   : > { %v2080_v46 = vadd.f32 %v2016_v4, %v1924_v40  ;;  %v1792_v17 = vadd.f32 %v1731_v11, %v3564_v28  ;;  %v1971_v40 = vunpack.c.l.b16 %v1958_v7 }
 0x250   : > { %v2220_v1 = vadd.f32 %v2156_v21, %v2080_v46  ;;  %v1863_v57 = vpop.f32.mrf.mxu2  ;;  %v2111_v21 = vunpack.c.l.b16 %v2105_v36 }
 0x251   : > { %v1925_v27 = vadd.f32 %v1863_v57, %v1791_v12 }
 0x252   : > { %v2252_v42 = vmax.f32 %v2220_v1, 0.0  ;;  %2624 = vmatmul.msk.bf16.gmra.mxu3 %vm666_vm4, %v3568_v22  ;;  %v1968_v22 = vsel %vm2811_vm3, %v1963_v54, %v1967_v41  ;;  %v2113_v14 = vpack.c.b16 %v2112_v49, %v2111_v21 }
 0x253   : > { %v1972_v19 = vunpack.c.l.b16 %v1968_v22 }
 0x254   : > { %2284 = vst [vmem:[%s3705_s14 + $0x58] sm:$0xff] %v2252_v42  ;;  %v2159_v35 = vpop.f32.mrf.mxu0 }
 0x255   : > { %v2019_v43 = vpop.f32.mrf.mxu3  ;;  %v1734_v53 = vpop.f32.mrf.mxu1  ;;  %v1973_v39 = vpack.c.b16 %v1972_v19, %v1971_v40 }
 0x256   : > { %v2081_v13 = vadd.f32 %v2019_v43, %v1925_v27  ;;  %v1793_v4 = vadd.f32 %v1734_v53, %v3575_v58 }
 0x257   : > { %2642 = vmatmul.msk.bf16.gmra.mxu0 %vm666_vm4, %v1683_v38 }
 0x258   : > { %v2221_v37 = vadd.f32 %v2159_v35, %v2081_v13  ;;  %v1865_v15 = vpop.f32.mrf.mxu2  ;;  %2587 = vmatmul.msk.bf16.gmra.mxu1 %vm666_vm4, %v1683_v38 }
 0x259   : > { %v1926_v3 = vadd.f32 %v1865_v15, %v1792_v17 }
 0x25a   : > { %v2253_v33 = vmax.f32 %v2221_v37, 0.0 }
 0x25c   : > { %2285 = vst [vmem:[%s3705_s14 + $0x60] sm:$0xff] %v2253_v33  ;;  %v2161_v50 = vpop.f32.mrf.mxu0 }
 0x25d   : > { %v2021_v28 = vpop.f32.mrf.mxu3  ;;  %2608 = vmatmul.msk.bf16.gmra.mxu2 %vm666_vm4, %v2664_v55  ;;  %v1736_v48 = vpop.f32.mrf.mxu1 }
 0x25e   : > { %v2082_v6 = vadd.f32 %v2021_v28, %v1926_v3  ;;  %v1794_v12 = vadd.f32 %v1736_v48, %v3580_v31 }
 0x260   : > { %v2222_v18 = vadd.f32 %v2161_v50, %v2082_v6  ;;  %v1868_v11 = vpop.f32.mrf.mxu2 }
 0x261   : > { %v1927_v34 = vadd.f32 %v1868_v11, %v1793_v4 }
 0x262   : > { %v2254_v46 = vmax.f32 %v2222_v18, 0.0  ;;  %2625 = vmatmul.msk.bf16.gmra.mxu3 %vm666_vm4, %v1973_v39 }
 0x264   : > { %2286 = vst [vmem:[%s3705_s14 + $0x68] sm:$0xff] %v2254_v46  ;;  %v2164_v62 = vpop.f32.mrf.mxu0 }
 0x265   : > { %v2024_v45 = vpop.f32.mrf.mxu3  ;;  %v1739_v10 = vpop.f32.mrf.mxu1 }
 0x266   : > { %v2083_v24 = vadd.f32 %v2024_v45, %v1927_v34  ;;  %v1795_v35 = vadd.f32 %v1739_v10, %v3589_v16 }
 0x267   : > { %2643 = vmatmul.msk.bf16.gmra.mxu0 %vm666_vm4, %v2113_v14 }
 0x268   : > { %v2223_v1 = vadd.f32 %v2164_v62, %v2083_v24  ;;  %v1870_v57 = vpop.f32.mrf.mxu2 }
 0x269   : > { %v1928_v42 = vadd.f32 %v1870_v57, %v1794_v12 }
 0x26a   : > { %v2255_v58 = vmax.f32 %v2223_v1, 0.0 }
 0x26c   : > { %2287 = vst [vmem:[%s3705_s14 + $0x70] sm:$0xff] %v2255_v58  ;;  %v2166_v27 = vpop.f32.mrf.mxu0 }
 0x26d   : > { %v2026_v38 = vpop.f32.mrf.mxu3  ;;  %v1741_v30 = vpop.f32.mrf.mxu1 }
 0x26e   : > { %v2084_v54 = vadd.f32 %v2026_v38, %v1928_v42  ;;  %v1796_v37 = vadd.f32 %v1741_v30, %v3594_v26 }
 0x270   : > { %v2224_v41 = vadd.f32 %v2166_v27, %v2084_v54  ;;  %v1873_v9 = vpop.f32.mrf.mxu2 }
 0x271   : > { %v1929_v53 = vadd.f32 %v1873_v9, %v1795_v35 }
 0x272   : > { %v2256_v43 = vmax.f32 %v2224_v41, 0.0 }
 0x274   : > { %2288 = vst [vmem:[%s3705_s14 + $0x78] sm:$0xff] %v2256_v43  ;;  %v2169_v13 = vpop.f32.mrf.mxu0 }
 0x275   : > { %v2029_v7 = vpop.f32.mrf.mxu3  ;;  %v1744_v22 = vpop.f32.mrf.mxu1 }
 0x276   : > { %v2085_v31 = vadd.f32 %v2029_v7, %v1929_v53  ;;  %v1797_v40 = vadd.f32 %v1744_v22, %v3603_v59 }
 0x278   : > { %v2225_v60 = vadd.f32 %v2169_v13, %v2085_v31  ;;  %v1875_v17 = vpop.f32.mrf.mxu2 }
 0x279   : > { %v1930_v32 = vadd.f32 %v1875_v17, %v1796_v37 }
 0x27a   : > { %v2257_v15 = vmax.f32 %v2225_v60, 0.0 }
 0x27c   : > { %2289 = vst [vmem:[%s3705_s14 + $0x80] sm:$0xff] %v2257_v15  ;;  %v2171_v44 = vpop.f32.mrf.mxu0 }
 0x27d   : > { %v2031_v55 = vpop.f32.mrf.mxu3  ;;  %v1746_v33 = vpop.f32.mrf.mxu1 }
 0x27e   : > { %v2086_v16 = vadd.f32 %v2031_v55, %v1930_v32  ;;  %v1798_v39 = vadd.f32 %v1746_v33, %v3608_v47 }
 0x280   : > { %v2226_v3 = vadd.f32 %v2171_v44, %v2086_v16  ;;  %v1878_v19 = vpop.f32.mrf.mxu2 }
 0x281   : > { %v1931_v36 = vadd.f32 %v1878_v19, %v1797_v40 }
 0x282   : > { %v2258_v50 = vmax.f32 %v2226_v3, 0.0 }
 0x284   : > { %2290 = vst [vmem:[%s3705_s14 + $0x88] sm:$0xff] %v2258_v50  ;;  %v2174_v25 = vpop.f32.mrf.mxu0 }
 0x285   : > { %v2034_v28 = vpop.f32.mrf.mxu3  ;;  %v1749_v48 = vpop.f32.mrf.mxu1 }
 0x286   : > { %v2087_v26 = vadd.f32 %v2034_v28, %v1931_v36  ;;  %v1799_v14 = vadd.f32 %v1749_v48, %v3617_v23 }
 0x288   : > { %v2227_v6 = vadd.f32 %v2174_v25, %v2087_v26  ;;  %v1880_v21 = vpop.f32.mrf.mxu2 }
 0x289   : > { %v1932_v18 = vadd.f32 %v1880_v21, %v1798_v39 }
 0x28a   : > { %v2259_v49 = vmax.f32 %v2227_v6, 0.0 }
 0x28c   : > { %2291 = vst [vmem:[%s3705_s14 + $0x90] sm:$0xff] %v2259_v49  ;;  %v2176_v4 = vpop.f32.mrf.mxu0 }
 0x28d   : > { %v2036_v11 = vpop.f32.mrf.mxu3  ;;  %v1751_v46 = vpop.f32.mrf.mxu1 }
 0x28e   : > { %v2088_v59 = vadd.f32 %v2036_v11, %v1932_v18  ;;  %v1800_v58 = vadd.f32 %v1751_v46, %v3622_v61 }
 0x290   : > { %v2228_v34 = vadd.f32 %v2176_v4, %v2088_v59  ;;  %v1883_v62 = vpop.f32.mrf.mxu2 }
 0x291   : > { %v1933_v10 = vadd.f32 %v1883_v62, %v1799_v14 }
 0x292   : > { %v2260_v45 = vmax.f32 %v2228_v34, 0.0 }
 0x294   : > { %2292 = vst [vmem:[%s3705_s14 + $0x98] sm:$0xff] %v2260_v45  ;;  %v2179_v24 = vpop.f32.mrf.mxu0 }
 0x295   : > { %v2039_v1 = vpop.f32.mrf.mxu3  ;;  %v1754_v12 = vpop.f32.mrf.mxu1 }
 0x296   : > { %v2089_v47 = vadd.f32 %v2039_v1, %v1933_v10  ;;  %v1801_v9 = vadd.f32 %v1754_v12, %v3631_v56 }
 0x298   : > { %v2229_v57 = vadd.f32 %v2179_v24, %v2089_v47  ;;  %v1885_v42 = vpop.f32.mrf.mxu2 }
 0x299   : > { %v1934_v38 = vadd.f32 %v1885_v42, %v1800_v58 }
 0x29a   : > { %v2261_v27 = vmax.f32 %v2229_v57, 0.0 }
 0x29c   : > { %2293 = vst [vmem:[%s3705_s14 + $0xa0] sm:$0xff] %v2261_v27  ;;  %v2181_v30 = vpop.f32.mrf.mxu0 }
 0x29d   : > { %v2041_v54 = vpop.f32.mrf.mxu3  ;;  %v1756_v41 = vpop.f32.mrf.mxu1 }
 0x29e   : > { %v2090_v23 = vadd.f32 %v2041_v54, %v1934_v38  ;;  %v1802_v37 = vadd.f32 %v1756_v41, %v3636_v0 }
 0x2a0   : > { %v2230_v35 = vadd.f32 %v2181_v30, %v2090_v23  ;;  %v1888_v43 = vpop.f32.mrf.mxu2 }
 0x2a1   : > { %v1935_v13 = vadd.f32 %v1888_v43, %v1801_v9 }
 0x2a2   : > { %v2262_v53 = vmax.f32 %v2230_v35, 0.0 }
 0x2a4   : > { %2294 = vst [vmem:[%s3705_s14 + $0xa8] sm:$0xff] %v2262_v53  ;;  %v2184_v7 = vpop.f32.mrf.mxu0 }
 0x2a5   : > { %v2044_v22 = vpop.f32.mrf.mxu3  ;;  %v1759_v31 = vpop.f32.mrf.mxu1 }
 0x2a6   : > { %v2091_v61 = vadd.f32 %v2044_v22, %v1935_v13  ;;  %v1803_v3 = vadd.f32 %v1759_v31, %v3645_v29 }
 0x2a8   : > { %v2231_v60 = vadd.f32 %v2184_v7, %v2091_v61  ;;  %v1890_v17 = vpop.f32.mrf.mxu2 }
 0x2a9   : > { %v1936_v32 = vadd.f32 %v1890_v17, %v1802_v37 }
 0x2aa   : > { %v2263_v15 = vmax.f32 %v2231_v60, 0.0 }
 0x2ac   : > { %2295 = vst [vmem:[%s3705_s14 + $0xb0] sm:$0xff] %v2263_v15  ;;  %v2186_v44 = vpop.f32.mrf.mxu0 }
 0x2ad   : > { %v2046_v55 = vpop.f32.mrf.mxu3  ;;  %v1761_v33 = vpop.f32.mrf.mxu1 }
 0x2ae   : > { %v2092_v56 = vadd.f32 %v2046_v55, %v1936_v32  ;;  %v1804_v26 = vadd.f32 %v1761_v33, %v3650_v52 }
 0x2b0   : > { %v2232_v16 = vadd.f32 %v2186_v44, %v2092_v56  ;;  %v1893_v40 = vpop.f32.mrf.mxu2 }
 0x2b1   : > { %v1937_v50 = vadd.f32 %v1893_v40, %v1803_v3 }
 0x2b2   : > { %v2264_v19 = vmax.f32 %v2232_v16, 0.0 }
 0x2b4   : > { %2296 = vst [vmem:[%s3705_s14 + $0xb8] sm:$0xff] %v2264_v19  ;;  %v2189_v36 = vpop.f32.mrf.mxu0 }
 0x2b5   : > { %v2049_v25 = vpop.f32.mrf.mxu3  ;;  %v1764_v28 = vpop.f32.mrf.mxu1 }
 0x2b6   : > { %v2093_v0 = vadd.f32 %v2049_v25, %v1937_v50  ;;  %v1805_v46 = vadd.f32 %v1764_v28, %v3659_v20 }
 0x2b8   : > { %v2233_v48 = vadd.f32 %v2189_v36, %v2093_v0  ;;  %v1895_v6 = vpop.f32.mrf.mxu2 }
 0x2b9   : > { %v1938_v21 = vadd.f32 %v1895_v6, %v1804_v26 }
 0x2ba   : > { %v2265_v39 = vmax.f32 %v2233_v48, 0.0 }
 0x2bc   : > { %2297 = vst [vmem:[%s3705_s14 + $0xc0] sm:$0xff] %v2265_v39  ;;  %v2191_v49 = vpop.f32.mrf.mxu0 }
 0x2bd   : > { %v2051_v18 = vpop.f32.mrf.mxu3  ;;  %v1766_v4 = vpop.f32.mrf.mxu1 }
 0x2be   : > { %v2094_v29 = vadd.f32 %v2051_v18, %v1938_v21  ;;  %v1806_v1 = vadd.f32 %v1766_v4, %v3664_v8 }
 0x2c0   : > { %v2234_v11 = vadd.f32 %v2191_v49, %v2094_v29  ;;  %v1898_v59 = vpop.f32.mrf.mxu2 }
 0x2c1   : > { %v1939_v14 = vadd.f32 %v1898_v59, %v1805_v46 }
 0x2c2   : > { %v2266_v34 = vmax.f32 %v2234_v11, 0.0 }
 0x2c4   : > { %2298 = vst [vmem:[%s3705_s14 + $0xc8] sm:$0xff] %v2266_v34  ;;  %v2194_v62 = vpop.f32.mrf.mxu0 }
 0x2c5   : > { %v2054_v45 = vpop.f32.mrf.mxu3  ;;  %v1769_v52 = vpop.f32.mrf.mxu1 }
 0x2c6   : > { %v2095_v10 = vadd.f32 %v2054_v45, %v1939_v14  ;;  %v1807_v38 = vadd.f32 %v1769_v52, %v3673_v51 }
 0x2c8   : > { %v2235_v24 = vadd.f32 %v2194_v62, %v2095_v10  ;;  %v1900_v12 = vpop.f32.mrf.mxu2 }
 0x2c9   : > { %v1940_v57 = vadd.f32 %v1900_v12, %v1806_v1 }
 0x2ca   : > { %v2267_v47 = vmax.f32 %v2235_v24, 0.0 }
 0x2cc   : > { %2299 = vst [vmem:[%s3705_s14 + $0xd0] sm:$0xff] %v2267_v47  ;;  %v2196_v58 = vpop.f32.mrf.mxu0 }
 0x2cd   : > { %v2056_v42 = vpop.f32.mrf.mxu3  ;;  %v1771_v54 = vpop.f32.mrf.mxu1 }
 0x2ce   : > { %v2096_v27 = vadd.f32 %v2056_v42, %v1940_v57  ;;  %v1808_v53 = vadd.f32 %v1771_v54, %v3678_v63 }
 0x2d0   : > { %v2236_v20 = vadd.f32 %v2196_v58, %v2096_v27  ;;  %v1903_v30 = vpop.f32.mrf.mxu2 }
 0x2d1   : > { %v1941_v23 = vadd.f32 %v1903_v30, %v1807_v38 }
 0x2d2   : > { %v2268_v41 = vmax.f32 %v2236_v20, 0.0 }
 0x2d4   : > { %2300 = vst [vmem:[%s3705_s14 + $0xd8] sm:$0xff] %v2268_v41  ;;  %v2199_v35 = vpop.f32.mrf.mxu0 }
 0x2d5   : > { %v2059_v9 = vpop.f32.mrf.mxu3  ;;  %v1774_v31 = vpop.f32.mrf.mxu1 }
 0x2d6   : > { %v2097_v43 = vadd.f32 %v2059_v9, %v1941_v23  ;;  %v1809_v17 = vadd.f32 %v1774_v31, %v3687_v2 }
 0x2d8   : > { %v2237_v8 = vadd.f32 %v2199_v35, %v2097_v43  ;;  %v1905_v13 = vpop.f32.mrf.mxu2 }
 0x2d9   : > { %v1942_v22 = vadd.f32 %v1905_v13, %v1808_v53 }
 0x2da   : > { %v2269_v7 = vmax.f32 %v2237_v8, 0.0 }
 0x2dc   : > { %2301 = vst [vmem:[%s3705_s14 + $0xe0] sm:$0xff] %v2269_v7  ;;  %v2201_v61 = vpop.f32.mrf.mxu0 }
 0x2dd   : > { %v2061_v60 = vpop.f32.mrf.mxu3  ;;  %v1776_v55 = vpop.f32.mrf.mxu1 }
 0x2de   : > { %v2098_v51 = vadd.f32 %v2061_v60, %v1942_v22  ;;  %v1810_v3 = vadd.f32 %v1776_v55, %v3692_v5 }
 0x2e0   : > { %v2238_v37 = vadd.f32 %v2201_v61, %v2098_v51  ;;  %v1908_v15 = vpop.f32.mrf.mxu2 }
 0x2e1   : > { %v1943_v44 = vadd.f32 %v1908_v15, %v1809_v17 }
 0x2e2   : > { %v2270_v32 = vmax.f32 %v2238_v37, 0.0 }
 0x2e4   : > { %2302 = vst [vmem:[%s3705_s14 + $0xe8] sm:$0xff] %v2270_v32  ;;  %v2204_v33 = vpop.f32.mrf.mxu0 }
 0x2e5   : > { %v2064_v63 = vpop.f32.mrf.mxu3 }
 0x2e6   : > { %v2099_v56 = vadd.f32 %v2064_v63, %v1943_v44 }
 0x2e8   : > { %v2239_v16 = vadd.f32 %v2204_v33, %v2099_v56  ;;  %v1910_v40 = vpop.f32.mrf.mxu2 }
 0x2e9   : > { %v1944_v50 = vadd.f32 %v1910_v40, %v1810_v3 }
 0x2ea   : > { %v2271_v19 = vmax.f32 %v2239_v16, 0.0 }
 0x2ec   : > { %2303 = vst [vmem:[%s3705_s14 + $0xf0] sm:$0xff] %v2271_v19  ;;  %v2206_v28 = vpop.f32.mrf.mxu0 }
 0x2ed   : > { %v2066_v36 = vpop.f32.mrf.mxu3 }
 0x2ee   : > { %v2100_v25 = vadd.f32 %v2066_v36, %v1944_v50 }
 0x2f0   : > { %v2240_v2 = vadd.f32 %v2206_v28, %v2100_v25 }
 0x2f2   : > { %v2272_v0 = vmax.f32 %v2240_v2, 0.0 }
 0x2f4   : > { %2304 = vst [vmem:[%s3705_s14 + $0xf8] sm:$0xff] %v2272_v0 }
 0x2f5 PF: > { %s12_s11 = sadd.s32 1, %s2723_s11   ;;  %s3997_s9 = smov %s2719_s10 }
 0x2f6   : > { %p9_p5 = scmp.ge.s32.totalorder %s12_s11, 4   ;;  %s3998_s10 = smov %s4000_s12 }
 0x2f8   :  { %11 = sbr.rel (!%p9_p5) target bundleno = 2 (0x2), region = 67 }

</bundles_post_ra>
